<compile_context>
chip_gen: v7x
topology: tpu7x:2x2x1
jax: 0.10.0
libtpu: 0.0.40
codegen_flags: <defaults>
</compile_context>

<pallas_src>
import numpy as np
import jax
import jax.numpy as jnp
from jax import lax
from jax.experimental import pallas as pl
from jax.experimental.pallas import tpu as pltpu


def fused_cnn_kernel(x_ref, a1_ref, b1_ref, b2w_ref, b2_ref, o_ref):
    """Fused conv1+ReLU+conv2+ReLU, fully VMEM resident, single invocation.

    x_ref  : (N, H, W)            raw input (Cin == 1 squeezed)          VMEM
    a1_ref : (5, W, OW1*C1)       conv1 lowered weights (per kh row)     VMEM
    b1_ref : (1, 1, OW1*C1)       conv1 bias tiled over ow               VMEM
    b2w_ref: (5, OW1*C1, C2*OW2)  conv2 lowered weights (per kh row)     VMEM
    b2_ref : (1, 1, C2*OW2)       conv2 bias repeated over ow            VMEM
    o_ref  : (N, C2, OH2, OW2)    output, already NCHW                   VMEM
    """
    N, H, _ = x_ref.shape
    KH = a1_ref.shape[0]
    _, C2, OH2, OW2 = o_ref.shape
    OH1 = H - KH + 1
    OW1C1 = a1_ref.shape[-1]
    C2OW2 = b2w_ref.shape[-1]

    x = x_ref[...]                                              # (N, H, W), 1 load

    # ---- conv1 + bias + ReLU: 5 row-shifted matmuls, flat (ow, c) lanes ----
    y1 = jnp.broadcast_to(b1_ref[...], (N, OH1, OW1C1))
    for kh in range(KH):
        y1 = y1 + lax.dot_general(
            x[:, kh:kh + OH1, :], a1_ref[kh],                   # (N,OH1,W)@(W,OW1*C1)
            dimension_numbers=(((2,), (0,)), ((), ())),
            preferred_element_type=jnp.float32)
    y1 = jnp.maximum(y1, 0.0)                                   # (N, OH1, OW1*C1)

    # ---- conv2 + bias + ReLU: 5 row-shifted matmuls, flat (c, ow) lanes ----
    acc = jnp.broadcast_to(b2_ref[...], (N, OH2, C2OW2))
    for kh in range(KH):
        acc = acc + lax.dot_general(
            y1[:, kh:kh + OH2, :], b2w_ref[kh],                 # (N,OH2,240)@(240,160)
            dimension_numbers=(((2,), (0,)), ((), ())),
            preferred_element_type=jnp.float32)
    y2 = jnp.maximum(acc, 0.0)                                  # (N, OH2, C2*OW2)

    # ---- NCHW store: contiguous 8-lane block per output channel ----
    for co in range(C2):
        o_ref[:, co, :, :] = y2[:, :, co * OW2:(co + 1) * OW2].astype(o_ref.dtype)


def fused_cnn(x3, a1, b1f, b2w, b2f):
    """Single pallas_call for the whole forward pass (everything in VMEM)."""
    N, H, W = x3.shape
    KH = a1.shape[0]
    OH1, OW1 = H - KH + 1, W - KH + 1
    OH2, OW2 = OH1 - KH + 1, OW1 - KH + 1
    C2 = b2w.shape[-1] // OW2
    return pl.pallas_call(
        fused_cnn_kernel,
        out_shape=jax.ShapeDtypeStruct((N, C2, OH2, OW2), jnp.float32),
        in_specs=[pl.BlockSpec(memory_space=pltpu.MemorySpace.VMEM)] * 5,
        out_specs=pl.BlockSpec(memory_space=pltpu.MemorySpace.VMEM),
    )(x3, a1, b1f, b2w, b2f)


def prepare_params(w1, b1, w2, b2, H=16, W=16):
    """One-time host-side repack of PyTorch OIHW params into lowered-conv
    matrices (input spatial size H, W is baked in).

    conv1:  A1[kh, w, ow*C1 + c]        = w1[c, 0, kh, w - ow]   (0 <= w-ow < 5)
    conv2:  B2[kh, owi*CIN + ci, co*OW2 + owo] = w2[co, ci, kh, owi - owo]
    """
    w1 = np.asarray(w1, np.float32); b1 = np.asarray(b1, np.float32)
    w2 = np.asarray(w2, np.float32); b2 = np.asarray(b2, np.float32)
    C1, _, KH, KW = w1.shape                       # (20, 1, 5, 5)
    C2, CIN, _, _ = w2.shape                       # (20, 20, 5, 5)
    OH1, OW1 = H - KH + 1, W - KW + 1              # 12, 12
    OH2, OW2 = OH1 - KH + 1, OW1 - KW + 1          # 8, 8

    A1 = np.zeros((KH, W, OW1 * C1), np.float32)
    for kh in range(KH):
        for ow in range(OW1):
            for kw in range(KW):
                A1[kh, ow + kw, ow * C1:(ow + 1) * C1] = w1[:, 0, kh, kw]
    b1f = np.tile(b1, OW1).reshape(1, 1, OW1 * C1)

    B2 = np.zeros((KH, OW1 * CIN, C2 * OW2), np.float32)
    for kh in range(KH):
        for owo in range(OW2):
            for kw in range(KW):
                owi = owo + kw
                for ci in range(CIN):
                    B2[kh, owi * CIN + ci, owo::OW2] = w2[:, ci, kh, kw]
    b2f = np.repeat(b2, OW2).reshape(1, 1, C2 * OW2)

    return (jnp.asarray(A1), jnp.asarray(b1f), jnp.asarray(B2), jnp.asarray(b2f))


@jax.jit
def model_forward(x_nchw, a1, b1f, b2w, b2f):
    # Cin == 1: squeezing the channel dim is a free (metadata-only) reshape.
    N, _, H, W = x_nchw.shape
    x3 = x_nchw.reshape(N, H, W).astype(jnp.float32)
    return fused_cnn(x3, a1, b1f, b2w, b2f)        # (N, 20, 8, 8) NCHW, no post-op


def init_params(key):
    """Deterministic PyTorch-style (kaiming-uniform) init. Weights in OIHW."""
    k1, k2, k3, k4 = jax.random.split(key, 4)

    def conv_init(kw_, kb_, cout, cin, k):
        bound = 1.0 / jnp.sqrt(cin * k * k)
        w = jax.random.uniform(kw_, (cout, cin, k, k), jnp.float32, -bound, bound)
        b = jax.random.uniform(kb_, (cout,), jnp.float32, -bound, bound)
        return w, b

    w1, b1 = conv_init(k1, k2, 20, 1, 5)
    w2, b2 = conv_init(k3, k4, 20, 20, 5)
    return (w1, b1), (w2, b2)


def reference_forward(x_nchw, w1, b1, w2, b2):
    def conv(x, w, b):
        y = lax.conv_general_dilated(
            x, w, window_strides=(1, 1), padding="VALID",
            dimension_numbers=("NCHW", "OIHW", "NCHW"))
        return jnp.maximum(y + b.reshape(1, -1, 1, 1), 0.0)
    return conv(conv(x_nchw, w1, b1), w2, b2)


if __name__ == "__main__":
    key = jax.random.PRNGKey(0)
    kx, kp = jax.random.split(key)
    # batch=2, channels=1 (required by conv1), spatial=16x16
    x = jax.random.normal(kx, (2, 1, 16, 16), jnp.float32)
    (w1, b1), (w2, b2) = init_params(kp)

    # One-time parameter repack into lowered-conv matrices (host side).
    a1, b1f, b2w, b2f = prepare_params(w1, b1, w2, b2, H=16, W=16)

    out = model_forward(x, a1, b1f, b2w, b2f)
    out = jax.block_until_ready(out)

    ref = reference_forward(x, w1, b1, w2, b2)
    assert out.shape == (2, 20, 8, 8), out.shape
    assert jnp.allclose(out, ref, atol=1e-4, rtol=1e-4), "mismatch vs reference"

    print("KERNEL_OK")
</pallas_src>

<mosaic_0001>
module attributes {stable_mosaic.version = 11 : i64} {
  func.func @fused_cnn_kernel(%arg0: memref<2x16x16xf32, #tpu.memory_space<vmem>>, %arg1: memref<5x16x240xf32, #tpu.memory_space<vmem>>, %arg2: memref<1x1x240xf32, #tpu.memory_space<vmem>>, %arg3: memref<5x240x160xf32, #tpu.memory_space<vmem>>, %arg4: memref<1x1x160xf32, #tpu.memory_space<vmem>>, %arg5: memref<2x20x8x8xf32, #tpu.memory_space<vmem>>) attributes {dimension_semantics = [], scalar_prefetch = 0 : i64, scratch_operands = 0 : i64, tpu.core_type = #tpu.core_type<tc>} {
    %c0 = arith.constant 0 : index
    %c0_0 = arith.constant 0 : index
    %c0_1 = arith.constant 0 : index
    %0 = vector.load %arg0[%c0, %c0_0, %c0_1] : memref<2x16x16xf32, #tpu.memory_space<vmem>>, vector<2x16x16xf32>
    %c0_2 = arith.constant 0 : index
    %c0_3 = arith.constant 0 : index
    %c0_4 = arith.constant 0 : index
    %1 = vector.load %arg2[%c0_2, %c0_3, %c0_4] : memref<1x1x240xf32, #tpu.memory_space<vmem>>, vector<1x1x240xf32>
    %2 = vector.shape_cast %1 : vector<1x1x240xf32> to vector<1x1x240xf32>
    %3 = vector.broadcast %2 : vector<1x1x240xf32> to vector<2x12x240xf32>
    %4 = vector.extract_strided_slice %0 {offsets = [0, 0, 0], sizes = [2, 12, 16], strides = [1, 1, 1]} : vector<2x16x16xf32> to vector<2x12x16xf32>
    %c0_5 = arith.constant 0 : index
    %c0_6 = arith.constant 0 : index
    %c0_7 = arith.constant 0 : index
    %5 = vector.load %arg1[%c0_5, %c0_6, %c0_7] : memref<5x16x240xf32, #tpu.memory_space<vmem>>, vector<1x16x240xf32>
    %6 = vector.shape_cast %5 : vector<1x16x240xf32> to vector<16x240xf32>
    %cst = arith.constant dense<0.000000e+00> : vector<2x12x240xf32>
    %7 = tpu.matmul %4, %6, %cst {dimension_numbers = #tpu.dot_dimension_numbers<[2], [0], [0, 1], [1], [0, 0, 0, 1, 1, 1], [], []>} : vector<2x12x16xf32>, vector<16x240xf32>, vector<2x12x240xf32> -> vector<2x12x240xf32>
    %8 = arith.addf %3, %7 : vector<2x12x240xf32>
    %9 = vector.extract_strided_slice %0 {offsets = [0, 1, 0], sizes = [2, 12, 16], strides = [1, 1, 1]} : vector<2x16x16xf32> to vector<2x12x16xf32>
    %c1 = arith.constant 1 : index
    %c0_8 = arith.constant 0 : index
    %c0_9 = arith.constant 0 : index
    %10 = vector.load %arg1[%c1, %c0_8, %c0_9] : memref<5x16x240xf32, #tpu.memory_space<vmem>>, vector<1x16x240xf32>
    %11 = vector.shape_cast %10 : vector<1x16x240xf32> to vector<16x240xf32>
    %cst_10 = arith.constant dense<0.000000e+00> : vector<2x12x240xf32>
    %12 = tpu.matmul %9, %11, %cst_10 {dimension_numbers = #tpu.dot_dimension_numbers<[2], [0], [0, 1], [1], [0, 0, 0, 1, 1, 1], [], []>} : vector<2x12x16xf32>, vector<16x240xf32>, vector<2x12x240xf32> -> vector<2x12x240xf32>
    %13 = arith.addf %8, %12 : vector<2x12x240xf32>
    %14 = vector.extract_strided_slice %0 {offsets = [0, 2, 0], sizes = [2, 12, 16], strides = [1, 1, 1]} : vector<2x16x16xf32> to vector<2x12x16xf32>
    %c2 = arith.constant 2 : index
    %c0_11 = arith.constant 0 : index
    %c0_12 = arith.constant 0 : index
    %15 = vector.load %arg1[%c2, %c0_11, %c0_12] : memref<5x16x240xf32, #tpu.memory_space<vmem>>, vector<1x16x240xf32>
    %16 = vector.shape_cast %15 : vector<1x16x240xf32> to vector<16x240xf32>
    %cst_13 = arith.constant dense<0.000000e+00> : vector<2x12x240xf32>
    %17 = tpu.matmul %14, %16, %cst_13 {dimension_numbers = #tpu.dot_dimension_numbers<[2], [0], [0, 1], [1], [0, 0, 0, 1, 1, 1], [], []>} : vector<2x12x16xf32>, vector<16x240xf32>, vector<2x12x240xf32> -> vector<2x12x240xf32>
    %18 = arith.addf %13, %17 : vector<2x12x240xf32>
    %19 = vector.extract_strided_slice %0 {offsets = [0, 3, 0], sizes = [2, 12, 16], strides = [1, 1, 1]} : vector<2x16x16xf32> to vector<2x12x16xf32>
    %c3 = arith.constant 3 : index
    %c0_14 = arith.constant 0 : index
    %c0_15 = arith.constant 0 : index
    %20 = vector.load %arg1[%c3, %c0_14, %c0_15] : memref<5x16x240xf32, #tpu.memory_space<vmem>>, vector<1x16x240xf32>
    %21 = vector.shape_cast %20 : vector<1x16x240xf32> to vector<16x240xf32>
    %cst_16 = arith.constant dense<0.000000e+00> : vector<2x12x240xf32>
    %22 = tpu.matmul %19, %21, %cst_16 {dimension_numbers = #tpu.dot_dimension_numbers<[2], [0], [0, 1], [1], [0, 0, 0, 1, 1, 1], [], []>} : vector<2x12x16xf32>, vector<16x240xf32>, vector<2x12x240xf32> -> vector<2x12x240xf32>
    %23 = arith.addf %18, %22 : vector<2x12x240xf32>
    %24 = vector.extract_strided_slice %0 {offsets = [0, 4, 0], sizes = [2, 12, 16], strides = [1, 1, 1]} : vector<2x16x16xf32> to vector<2x12x16xf32>
    %c4 = arith.constant 4 : index
    %c0_17 = arith.constant 0 : index
    %c0_18 = arith.constant 0 : index
    %25 = vector.load %arg1[%c4, %c0_17, %c0_18] : memref<5x16x240xf32, #tpu.memory_space<vmem>>, vector<1x16x240xf32>
    %26 = vector.shape_cast %25 : vector<1x16x240xf32> to vector<16x240xf32>
    %cst_19 = arith.constant dense<0.000000e+00> : vector<2x12x240xf32>
    %27 = tpu.matmul %24, %26, %cst_19 {dimension_numbers = #tpu.dot_dimension_numbers<[2], [0], [0, 1], [1], [0, 0, 0, 1, 1, 1], [], []>} : vector<2x12x16xf32>, vector<16x240xf32>, vector<2x12x240xf32> -> vector<2x12x240xf32>
    %28 = arith.addf %23, %27 : vector<2x12x240xf32>
    %cst_20 = arith.constant 0.000000e+00 : f32
    %29 = vector.broadcast %cst_20 : f32 to vector<2x12x240xf32>
    %30 = arith.maximumf %28, %29 : vector<2x12x240xf32>
    %c0_21 = arith.constant 0 : index
    %c0_22 = arith.constant 0 : index
    %c0_23 = arith.constant 0 : index
    %31 = vector.load %arg4[%c0_21, %c0_22, %c0_23] : memref<1x1x160xf32, #tpu.memory_space<vmem>>, vector<1x1x160xf32>
    %32 = vector.shape_cast %31 : vector<1x1x160xf32> to vector<1x1x160xf32>
    %33 = vector.broadcast %32 : vector<1x1x160xf32> to vector<2x8x160xf32>
    %34 = vector.extract_strided_slice %30 {offsets = [0, 0, 0], sizes = [2, 8, 240], strides = [1, 1, 1]} : vector<2x12x240xf32> to vector<2x8x240xf32>
    %c0_24 = arith.constant 0 : index
    %c0_25 = arith.constant 0 : index
    %c0_26 = arith.constant 0 : index
    %35 = vector.load %arg3[%c0_24, %c0_25, %c0_26] : memref<5x240x160xf32, #tpu.memory_space<vmem>>, vector<1x240x160xf32>
    %36 = vector.shape_cast %35 : vector<1x240x160xf32> to vector<240x160xf32>
    %cst_27 = arith.constant dense<0.000000e+00> : vector<2x8x160xf32>
    %37 = tpu.matmul %34, %36, %cst_27 {dimension_numbers = #tpu.dot_dimension_numbers<[2], [0], [0, 1], [1], [0, 0, 0, 1, 1, 1], [], []>} : vector<2x8x240xf32>, vector<240x160xf32>, vector<2x8x160xf32> -> vector<2x8x160xf32>
    %38 = arith.addf %33, %37 : vector<2x8x160xf32>
    %39 = vector.extract_strided_slice %30 {offsets = [0, 1, 0], sizes = [2, 8, 240], strides = [1, 1, 1]} : vector<2x12x240xf32> to vector<2x8x240xf32>
    %c1_28 = arith.constant 1 : index
    %c0_29 = arith.constant 0 : index
    %c0_30 = arith.constant 0 : index
    %40 = vector.load %arg3[%c1_28, %c0_29, %c0_30] : memref<5x240x160xf32, #tpu.memory_space<vmem>>, vector<1x240x160xf32>
    %41 = vector.shape_cast %40 : vector<1x240x160xf32> to vector<240x160xf32>
    %cst_31 = arith.constant dense<0.000000e+00> : vector<2x8x160xf32>
    %42 = tpu.matmul %39, %41, %cst_31 {dimension_numbers = #tpu.dot_dimension_numbers<[2], [0], [0, 1], [1], [0, 0, 0, 1, 1, 1], [], []>} : vector<2x8x240xf32>, vector<240x160xf32>, vector<2x8x160xf32> -> vector<2x8x160xf32>
    %43 = arith.addf %38, %42 : vector<2x8x160xf32>
    %44 = vector.extract_strided_slice %30 {offsets = [0, 2, 0], sizes = [2, 8, 240], strides = [1, 1, 1]} : vector<2x12x240xf32> to vector<2x8x240xf32>
    %c2_32 = arith.constant 2 : index
    %c0_33 = arith.constant 0 : index
    %c0_34 = arith.constant 0 : index
    %45 = vector.load %arg3[%c2_32, %c0_33, %c0_34] : memref<5x240x160xf32, #tpu.memory_space<vmem>>, vector<1x240x160xf32>
    %46 = vector.shape_cast %45 : vector<1x240x160xf32> to vector<240x160xf32>
    %cst_35 = arith.constant dense<0.000000e+00> : vector<2x8x160xf32>
    %47 = tpu.matmul %44, %46, %cst_35 {dimension_numbers = #tpu.dot_dimension_numbers<[2], [0], [0, 1], [1], [0, 0, 0, 1, 1, 1], [], []>} : vector<2x8x240xf32>, vector<240x160xf32>, vector<2x8x160xf32> -> vector<2x8x160xf32>
    %48 = arith.addf %43, %47 : vector<2x8x160xf32>
    %49 = vector.extract_strided_slice %30 {offsets = [0, 3, 0], sizes = [2, 8, 240], strides = [1, 1, 1]} : vector<2x12x240xf32> to vector<2x8x240xf32>
    %c3_36 = arith.constant 3 : index
    %c0_37 = arith.constant 0 : index
    %c0_38 = arith.constant 0 : index
    %50 = vector.load %arg3[%c3_36, %c0_37, %c0_38] : memref<5x240x160xf32, #tpu.memory_space<vmem>>, vector<1x240x160xf32>
    %51 = vector.shape_cast %50 : vector<1x240x160xf32> to vector<240x160xf32>
    %cst_39 = arith.constant dense<0.000000e+00> : vector<2x8x160xf32>
    %52 = tpu.matmul %49, %51, %cst_39 {dimension_numbers = #tpu.dot_dimension_numbers<[2], [0], [0, 1], [1], [0, 0, 0, 1, 1, 1], [], []>} : vector<2x8x240xf32>, vector<240x160xf32>, vector<2x8x160xf32> -> vector<2x8x160xf32>
    %53 = arith.addf %48, %52 : vector<2x8x160xf32>
    %54 = vector.extract_strided_slice %30 {offsets = [0, 4, 0], sizes = [2, 8, 240], strides = [1, 1, 1]} : vector<2x12x240xf32> to vector<2x8x240xf32>
    %c4_40 = arith.constant 4 : index
    %c0_41 = arith.constant 0 : index
    %c0_42 = arith.constant 0 : index
    %55 = vector.load %arg3[%c4_40, %c0_41, %c0_42] : memref<5x240x160xf32, #tpu.memory_space<vmem>>, vector<1x240x160xf32>
    %56 = vector.shape_cast %55 : vector<1x240x160xf32> to vector<240x160xf32>
    %cst_43 = arith.constant dense<0.000000e+00> : vector<2x8x160xf32>
    %57 = tpu.matmul %54, %56, %cst_43 {dimension_numbers = #tpu.dot_dimension_numbers<[2], [0], [0, 1], [1], [0, 0, 0, 1, 1, 1], [], []>} : vector<2x8x240xf32>, vector<240x160xf32>, vector<2x8x160xf32> -> vector<2x8x160xf32>
    %58 = arith.addf %53, %57 : vector<2x8x160xf32>
    %cst_44 = arith.constant 0.000000e+00 : f32
    %59 = vector.broadcast %cst_44 : f32 to vector<2x8x160xf32>
    %60 = arith.maximumf %58, %59 : vector<2x8x160xf32>
    %61 = vector.extract_strided_slice %60 {offsets = [0, 0, 0], sizes = [2, 8, 8], strides = [1, 1, 1]} : vector<2x8x160xf32> to vector<2x8x8xf32>
    %c0_45 = arith.constant 0 : index
    %c0_46 = arith.constant 0 : index
    %c0_47 = arith.constant 0 : index
    %c0_48 = arith.constant 0 : index
    %62 = vector.load %arg5[%c0_45, %c0_46, %c0_47, %c0_48] : memref<2x20x8x8xf32, #tpu.memory_space<vmem>>, vector<2x1x8x8xf32>
    %63 = vector.shape_cast %62 : vector<2x1x8x8xf32> to vector<2x8x8xf32>
    %64 = vector.shape_cast %61 : vector<2x8x8xf32> to vector<2x1x8x8xf32>
    tpu.vector_store %arg5[%c0_45, %c0_46, %c0_47, %c0_48], %64 {strides = array<i32>} : memref<2x20x8x8xf32, #tpu.memory_space<vmem>>, vector<2x1x8x8xf32>,
    %65 = vector.extract_strided_slice %60 {offsets = [0, 0, 8], sizes = [2, 8, 8], strides = [1, 1, 1]} : vector<2x8x160xf32> to vector<2x8x8xf32>
    %c0_49 = arith.constant 0 : index
    %c1_50 = arith.constant 1 : index
    %c0_51 = arith.constant 0 : index
    %c0_52 = arith.constant 0 : index
    %66 = vector.load %arg5[%c0_49, %c1_50, %c0_51, %c0_52] : memref<2x20x8x8xf32, #tpu.memory_space<vmem>>, vector<2x1x8x8xf32>
    %67 = vector.shape_cast %66 : vector<2x1x8x8xf32> to vector<2x8x8xf32>
    %68 = vector.shape_cast %65 : vector<2x8x8xf32> to vector<2x1x8x8xf32>
    tpu.vector_store %arg5[%c0_49, %c1_50, %c0_51, %c0_52], %68 {strides = array<i32>} : memref<2x20x8x8xf32, #tpu.memory_space<vmem>>, vector<2x1x8x8xf32>,
    %69 = vector.extract_strided_slice %60 {offsets = [0, 0, 16], sizes = [2, 8, 8], strides = [1, 1, 1]} : vector<2x8x160xf32> to vector<2x8x8xf32>
    %c0_53 = arith.constant 0 : index
    %c2_54 = arith.constant 2 : index
    %c0_55 = arith.constant 0 : index
    %c0_56 = arith.constant 0 : index
    %70 = vector.load %arg5[%c0_53, %c2_54, %c0_55, %c0_56] : memref<2x20x8x8xf32, #tpu.memory_space<vmem>>, vector<2x1x8x8xf32>
    %71 = vector.shape_cast %70 : vector<2x1x8x8xf32> to vector<2x8x8xf32>
    %72 = vector.shape_cast %69 : vector<2x8x8xf32> to vector<2x1x8x8xf32>
    tpu.vector_store %arg5[%c0_53, %c2_54, %c0_55, %c0_56], %72 {strides = array<i32>} : memref<2x20x8x8xf32, #tpu.memory_space<vmem>>, vector<2x1x8x8xf32>,
    %73 = vector.extract_strided_slice %60 {offsets = [0, 0, 24], sizes = [2, 8, 8], strides = [1, 1, 1]} : vector<2x8x160xf32> to vector<2x8x8xf32>
    %c0_57 = arith.constant 0 : index
    %c3_58 = arith.constant 3 : index
    %c0_59 = arith.constant 0 : index
    %c0_60 = arith.constant 0 : index
    %74 = vector.load %arg5[%c0_57, %c3_58, %c0_59, %c0_60] : memref<2x20x8x8xf32, #tpu.memory_space<vmem>>, vector<2x1x8x8xf32>
    %75 = vector.shape_cast %74 : vector<2x1x8x8xf32> to vector<2x8x8xf32>
    %76 = vector.shape_cast %73 : vector<2x8x8xf32> to vector<2x1x8x8xf32>
    tpu.vector_store %arg5[%c0_57, %c3_58, %c0_59, %c0_60], %76 {strides = array<i32>} : memref<2x20x8x8xf32, #tpu.memory_space<vmem>>, vector<2x1x8x8xf32>,
    %77 = vector.extract_strided_slice %60 {offsets = [0, 0, 32], sizes = [2, 8, 8], strides = [1, 1, 1]} : vector<2x8x160xf32> to vector<2x8x8xf32>
    %c0_61 = arith.constant 0 : index
    %c4_62 = arith.constant 4 : index
    %c0_63 = arith.constant 0 : index
    %c0_64 = arith.constant 0 : index
    %78 = vector.load %arg5[%c0_61, %c4_62, %c0_63, %c0_64] : memref<2x20x8x8xf32, #tpu.memory_space<vmem>>, vector<2x1x8x8xf32>
    %79 = vector.shape_cast %78 : vector<2x1x8x8xf32> to vector<2x8x8xf32>
    %80 = vector.shape_cast %77 : vector<2x8x8xf32> to vector<2x1x8x8xf32>
    tpu.vector_store %arg5[%c0_61, %c4_62, %c0_63, %c0_64], %80 {strides = array<i32>} : memref<2x20x8x8xf32, #tpu.memory_space<vmem>>, vector<2x1x8x8xf32>,
    %81 = vector.extract_strided_slice %60 {offsets = [0, 0, 40], sizes = [2, 8, 8], strides = [1, 1, 1]} : vector<2x8x160xf32> to vector<2x8x8xf32>
    %c0_65 = arith.constant 0 : index
    %c5 = arith.constant 5 : index
    %c0_66 = arith.constant 0 : index
    %c0_67 = arith.constant 0 : index
    %82 = vector.load %arg5[%c0_65, %c5, %c0_66, %c0_67] : memref<2x20x8x8xf32, #tpu.memory_space<vmem>>, vector<2x1x8x8xf32>
    %83 = vector.shape_cast %82 : vector<2x1x8x8xf32> to vector<2x8x8xf32>
    %84 = vector.shape_cast %81 : vector<2x8x8xf32> to vector<2x1x8x8xf32>
    tpu.vector_store %arg5[%c0_65, %c5, %c0_66, %c0_67], %84 {strides = array<i32>} : memref<2x20x8x8xf32, #tpu.memory_space<vmem>>, vector<2x1x8x8xf32>,
    %85 = vector.extract_strided_slice %60 {offsets = [0, 0, 48], sizes = [2, 8, 8], strides = [1, 1, 1]} : vector<2x8x160xf32> to vector<2x8x8xf32>
    %c0_68 = arith.constant 0 : index
    %c6 = arith.constant 6 : index
    %c0_69 = arith.constant 0 : index
    %c0_70 = arith.constant 0 : index
    %86 = vector.load %arg5[%c0_68, %c6, %c0_69, %c0_70] : memref<2x20x8x8xf32, #tpu.memory_space<vmem>>, vector<2x1x8x8xf32>
    %87 = vector.shape_cast %86 : vector<2x1x8x8xf32> to vector<2x8x8xf32>
    %88 = vector.shape_cast %85 : vector<2x8x8xf32> to vector<2x1x8x8xf32>
    tpu.vector_store %arg5[%c0_68, %c6, %c0_69, %c0_70], %88 {strides = array<i32>} : memref<2x20x8x8xf32, #tpu.memory_space<vmem>>, vector<2x1x8x8xf32>,
    %89 = vector.extract_strided_slice %60 {offsets = [0, 0, 56], sizes = [2, 8, 8], strides = [1, 1, 1]} : vector<2x8x160xf32> to vector<2x8x8xf32>
    %c0_71 = arith.constant 0 : index
    %c7 = arith.constant 7 : index
    %c0_72 = arith.constant 0 : index
    %c0_73 = arith.constant 0 : index
    %90 = vector.load %arg5[%c0_71, %c7, %c0_72, %c0_73] : memref<2x20x8x8xf32, #tpu.memory_space<vmem>>, vector<2x1x8x8xf32>
    %91 = vector.shape_cast %90 : vector<2x1x8x8xf32> to vector<2x8x8xf32>
    %92 = vector.shape_cast %89 : vector<2x8x8xf32> to vector<2x1x8x8xf32>
    tpu.vector_store %arg5[%c0_71, %c7, %c0_72, %c0_73], %92 {strides = array<i32>} : memref<2x20x8x8xf32, #tpu.memory_space<vmem>>, vector<2x1x8x8xf32>,
    %93 = vector.extract_strided_slice %60 {offsets = [0, 0, 64], sizes = [2, 8, 8], strides = [1, 1, 1]} : vector<2x8x160xf32> to vector<2x8x8xf32>
    %c0_74 = arith.constant 0 : index
    %c8 = arith.constant 8 : index
    %c0_75 = arith.constant 0 : index
    %c0_76 = arith.constant 0 : index
    %94 = vector.load %arg5[%c0_74, %c8, %c0_75, %c0_76] : memref<2x20x8x8xf32, #tpu.memory_space<vmem>>, vector<2x1x8x8xf32>
    %95 = vector.shape_cast %94 : vector<2x1x8x8xf32> to vector<2x8x8xf32>
    %96 = vector.shape_cast %93 : vector<2x8x8xf32> to vector<2x1x8x8xf32>
    tpu.vector_store %arg5[%c0_74, %c8, %c0_75, %c0_76], %96 {strides = array<i32>} : memref<2x20x8x8xf32, #tpu.memory_space<vmem>>, vector<2x1x8x8xf32>,
    %97 = vector.extract_strided_slice %60 {offsets = [0, 0, 72], sizes = [2, 8, 8], strides = [1, 1, 1]} : vector<2x8x160xf32> to vector<2x8x8xf32>
    %c0_77 = arith.constant 0 : index
    %c9 = arith.constant 9 : index
    %c0_78 = arith.constant 0 : index
    %c0_79 = arith.constant 0 : index
    %98 = vector.load %arg5[%c0_77, %c9, %c0_78, %c0_79] : memref<2x20x8x8xf32, #tpu.memory_space<vmem>>, vector<2x1x8x8xf32>
    %99 = vector.shape_cast %98 : vector<2x1x8x8xf32> to vector<2x8x8xf32>
    %100 = vector.shape_cast %97 : vector<2x8x8xf32> to vector<2x1x8x8xf32>
    tpu.vector_store %arg5[%c0_77, %c9, %c0_78, %c0_79], %100 {strides = array<i32>} : memref<2x20x8x8xf32, #tpu.memory_space<vmem>>, vector<2x1x8x8xf32>,
    %101 = vector.extract_strided_slice %60 {offsets = [0, 0, 80], sizes = [2, 8, 8], strides = [1, 1, 1]} : vector<2x8x160xf32> to vector<2x8x8xf32>
    %c0_80 = arith.constant 0 : index
    %c10 = arith.constant 10 : index
    %c0_81 = arith.constant 0 : index
    %c0_82 = arith.constant 0 : index
    %102 = vector.load %arg5[%c0_80, %c10, %c0_81, %c0_82] : memref<2x20x8x8xf32, #tpu.memory_space<vmem>>, vector<2x1x8x8xf32>
    %103 = vector.shape_cast %102 : vector<2x1x8x8xf32> to vector<2x8x8xf32>
    %104 = vector.shape_cast %101 : vector<2x8x8xf32> to vector<2x1x8x8xf32>
    tpu.vector_store %arg5[%c0_80, %c10, %c0_81, %c0_82], %104 {strides = array<i32>} : memref<2x20x8x8xf32, #tpu.memory_space<vmem>>, vector<2x1x8x8xf32>,
    %105 = vector.extract_strided_slice %60 {offsets = [0, 0, 88], sizes = [2, 8, 8], strides = [1, 1, 1]} : vector<2x8x160xf32> to vector<2x8x8xf32>
    %c0_83 = arith.constant 0 : index
    %c11 = arith.constant 11 : index
    %c0_84 = arith.constant 0 : index
    %c0_85 = arith.constant 0 : index
    %106 = vector.load %arg5[%c0_83, %c11, %c0_84, %c0_85] : memref<2x20x8x8xf32, #tpu.memory_space<vmem>>, vector<2x1x8x8xf32>
    %107 = vector.shape_cast %106 : vector<2x1x8x8xf32> to vector<2x8x8xf32>
    %108 = vector.shape_cast %105 : vector<2x8x8xf32> to vector<2x1x8x8xf32>
    tpu.vector_store %arg5[%c0_83, %c11, %c0_84, %c0_85], %108 {strides = array<i32>} : memref<2x20x8x8xf32, #tpu.memory_space<vmem>>, vector<2x1x8x8xf32>,
    %109 = vector.extract_strided_slice %60 {offsets = [0, 0, 96], sizes = [2, 8, 8], strides = [1, 1, 1]} : vector<2x8x160xf32> to vector<2x8x8xf32>
    %c0_86 = arith.constant 0 : index
    %c12 = arith.constant 12 : index
    %c0_87 = arith.constant 0 : index
    %c0_88 = arith.constant 0 : index
    %110 = vector.load %arg5[%c0_86, %c12, %c0_87, %c0_88] : memref<2x20x8x8xf32, #tpu.memory_space<vmem>>, vector<2x1x8x8xf32>
    %111 = vector.shape_cast %110 : vector<2x1x8x8xf32> to vector<2x8x8xf32>
    %112 = vector.shape_cast %109 : vector<2x8x8xf32> to vector<2x1x8x8xf32>
    tpu.vector_store %arg5[%c0_86, %c12, %c0_87, %c0_88], %112 {strides = array<i32>} : memref<2x20x8x8xf32, #tpu.memory_space<vmem>>, vector<2x1x8x8xf32>,
    %113 = vector.extract_strided_slice %60 {offsets = [0, 0, 104], sizes = [2, 8, 8], strides = [1, 1, 1]} : vector<2x8x160xf32> to vector<2x8x8xf32>
    %c0_89 = arith.constant 0 : index
    %c13 = arith.constant 13 : index
    %c0_90 = arith.constant 0 : index
    %c0_91 = arith.constant 0 : index
    %114 = vector.load %arg5[%c0_89, %c13, %c0_90, %c0_91] : memref<2x20x8x8xf32, #tpu.memory_space<vmem>>, vector<2x1x8x8xf32>
    %115 = vector.shape_cast %114 : vector<2x1x8x8xf32> to vector<2x8x8xf32>
    %116 = vector.shape_cast %113 : vector<2x8x8xf32> to vector<2x1x8x8xf32>
    tpu.vector_store %arg5[%c0_89, %c13, %c0_90, %c0_91], %116 {strides = array<i32>} : memref<2x20x8x8xf32, #tpu.memory_space<vmem>>, vector<2x1x8x8xf32>,
    %117 = vector.extract_strided_slice %60 {offsets = [0, 0, 112], sizes = [2, 8, 8], strides = [1, 1, 1]} : vector<2x8x160xf32> to vector<2x8x8xf32>
    %c0_92 = arith.constant 0 : index
    %c14 = arith.constant 14 : index
    %c0_93 = arith.constant 0 : index
    %c0_94 = arith.constant 0 : index
    %118 = vector.load %arg5[%c0_92, %c14, %c0_93, %c0_94] : memref<2x20x8x8xf32, #tpu.memory_space<vmem>>, vector<2x1x8x8xf32>
    %119 = vector.shape_cast %118 : vector<2x1x8x8xf32> to vector<2x8x8xf32>
    %120 = vector.shape_cast %117 : vector<2x8x8xf32> to vector<2x1x8x8xf32>
    tpu.vector_store %arg5[%c0_92, %c14, %c0_93, %c0_94], %120 {strides = array<i32>} : memref<2x20x8x8xf32, #tpu.memory_space<vmem>>, vector<2x1x8x8xf32>,
    %121 = vector.extract_strided_slice %60 {offsets = [0, 0, 120], sizes = [2, 8, 8], strides = [1, 1, 1]} : vector<2x8x160xf32> to vector<2x8x8xf32>
    %c0_95 = arith.constant 0 : index
    %c15 = arith.constant 15 : index
    %c0_96 = arith.constant 0 : index
    %c0_97 = arith.constant 0 : index
    %122 = vector.load %arg5[%c0_95, %c15, %c0_96, %c0_97] : memref<2x20x8x8xf32, #tpu.memory_space<vmem>>, vector<2x1x8x8xf32>
    %123 = vector.shape_cast %122 : vector<2x1x8x8xf32> to vector<2x8x8xf32>
    %124 = vector.shape_cast %121 : vector<2x8x8xf32> to vector<2x1x8x8xf32>
    tpu.vector_store %arg5[%c0_95, %c15, %c0_96, %c0_97], %124 {strides = array<i32>} : memref<2x20x8x8xf32, #tpu.memory_space<vmem>>, vector<2x1x8x8xf32>,
    %125 = vector.extract_strided_slice %60 {offsets = [0, 0, 128], sizes = [2, 8, 8], strides = [1, 1, 1]} : vector<2x8x160xf32> to vector<2x8x8xf32>
    %c0_98 = arith.constant 0 : index
    %c16 = arith.constant 16 : index
    %c0_99 = arith.constant 0 : index
    %c0_100 = arith.constant 0 : index
    %126 = vector.load %arg5[%c0_98, %c16, %c0_99, %c0_100] : memref<2x20x8x8xf32, #tpu.memory_space<vmem>>, vector<2x1x8x8xf32>
    %127 = vector.shape_cast %126 : vector<2x1x8x8xf32> to vector<2x8x8xf32>
    %128 = vector.shape_cast %125 : vector<2x8x8xf32> to vector<2x1x8x8xf32>
    tpu.vector_store %arg5[%c0_98, %c16, %c0_99, %c0_100], %128 {strides = array<i32>} : memref<2x20x8x8xf32, #tpu.memory_space<vmem>>, vector<2x1x8x8xf32>,
    %129 = vector.extract_strided_slice %60 {offsets = [0, 0, 136], sizes = [2, 8, 8], strides = [1, 1, 1]} : vector<2x8x160xf32> to vector<2x8x8xf32>
    %c0_101 = arith.constant 0 : index
    %c17 = arith.constant 17 : index
    %c0_102 = arith.constant 0 : index
    %c0_103 = arith.constant 0 : index
    %130 = vector.load %arg5[%c0_101, %c17, %c0_102, %c0_103] : memref<2x20x8x8xf32, #tpu.memory_space<vmem>>, vector<2x1x8x8xf32>
    %131 = vector.shape_cast %130 : vector<2x1x8x8xf32> to vector<2x8x8xf32>
    %132 = vector.shape_cast %129 : vector<2x8x8xf32> to vector<2x1x8x8xf32>
    tpu.vector_store %arg5[%c0_101, %c17, %c0_102, %c0_103], %132 {strides = array<i32>} : memref<2x20x8x8xf32, #tpu.memory_space<vmem>>, vector<2x1x8x8xf32>,
    %133 = vector.extract_strided_slice %60 {offsets = [0, 0, 144], sizes = [2, 8, 8], strides = [1, 1, 1]} : vector<2x8x160xf32> to vector<2x8x8xf32>
    %c0_104 = arith.constant 0 : index
    %c18 = arith.constant 18 : index
    %c0_105 = arith.constant 0 : index
    %c0_106 = arith.constant 0 : index
    %134 = vector.load %arg5[%c0_104, %c18, %c0_105, %c0_106] : memref<2x20x8x8xf32, #tpu.memory_space<vmem>>, vector<2x1x8x8xf32>
    %135 = vector.shape_cast %134 : vector<2x1x8x8xf32> to vector<2x8x8xf32>
    %136 = vector.shape_cast %133 : vector<2x8x8xf32> to vector<2x1x8x8xf32>
    tpu.vector_store %arg5[%c0_104, %c18, %c0_105, %c0_106], %136 {strides = array<i32>} : memref<2x20x8x8xf32, #tpu.memory_space<vmem>>, vector<2x1x8x8xf32>,
    %137 = vector.extract_strided_slice %60 {offsets = [0, 0, 152], sizes = [2, 8, 8], strides = [1, 1, 1]} : vector<2x8x160xf32> to vector<2x8x8xf32>
    %c0_107 = arith.constant 0 : index
    %c19 = arith.constant 19 : index
    %c0_108 = arith.constant 0 : index
    %c0_109 = arith.constant 0 : index
    %138 = vector.load %arg5[%c0_107, %c19, %c0_108, %c0_109] : memref<2x20x8x8xf32, #tpu.memory_space<vmem>>, vector<2x1x8x8xf32>
    %139 = vector.shape_cast %138 : vector<2x1x8x8xf32> to vector<2x8x8xf32>
    %140 = vector.shape_cast %137 : vector<2x8x8xf32> to vector<2x1x8x8xf32>
    tpu.vector_store %arg5[%c0_107, %c19, %c0_108, %c0_109], %140 {strides = array<i32>} : memref<2x20x8x8xf32, #tpu.memory_space<vmem>>, vector<2x1x8x8xf32>,
    return
  }
}

</mosaic_0001>

<bundles_post_ra>
// kernel: model_forward.1
= control target key start
LH: loop header
LB: loop body
LE: loop exit
PB: predicated region body
PF: predicated region fallthrough
CT: control target
= control target key end

     0   :  { %v2484_v3 = vmov 0.0   ;;  %vm49_vm0 = vcmask 130048   ;;  %vm180_vm1 = vcmask 1042432   ;;  %vm181_vm2 = vcmask 1046532   ;;  %s2485_s12 = smov 112   ;;  %s2486_s13 = smov 120   ;;  %s4093_s1 = inlined_call_operand.vmem [shape: f32[5,16,240], index: 1, kind: input, shape index: {}]   ;;  %s4094_s0 = inlined_call_operand.vmem [shape: f32[2,16,16], index: 0, kind: input, shape index: {}]   ;;  %s4095_s3 = inlined_call_operand.vmem [shape: f32[5,240,160], index: 3, kind: input, shape index: {}]   ;;  %s4096_s2 = inlined_call_operand.vmem [shape: f32[1,1,240], index: 2, kind: input, shape index: {}]   ;;  %s4097_s4 = inlined_call_operand.vmem [shape: f32[1,1,160], index: 4, kind: input, shape index: {}]   ;;  %s4098_s5 = inlined_call_operand.vmem [shape: f32[2,20,8,8], index: 5, kind: output, shape index: {}]  }
   0x1   :  { %v37_v0 = vld [vmem:[%s4093_s1 + $0x8] sm:$0xff]  ;;  %v39_v1 = vld [vmem:[%s4093_s1 + $0x18] sm:$0xff]  ;;  %v36_v2 = vld [vmem:[%s4093_s1] sm:$0xff]  ;;  %120 = vmatprep.mubr.f32.mxu0 %v2484_v3  ;;  %vm334_vm4 = vcmask 1041408   ;;  %vm335_vm5 = vcmask 1045508   ;;  %vm488_vm7 = vcmask 1040384  }
   0x2   :  { %v2112_v4 = vpack.c.bf16 %v39_v1, %v37_v0  ;;  %v38_v5 = vld [vmem:[%s4093_s1 + $0x10] sm:$0xff]  ;;  %v2546_v6 = vld [vmem:[%s4094_s0] sm:$0xff]  ;;  %v1774_v7 = vld [vmem:[%s4093_s1 + $0x28] sm:$0xff]  ;;  %vm489_vm8 = vcmask 1044484   ;;  %vm848_vm10 = vcmask 916480   ;;  %vm1164_vm11 = vcmask 1045504  }
   0x3   :  { %v2114_v8 = vpack.c.bf16 %v38_v5, %v36_v2  ;;  %v2553_v9 = vcombine.high %v2546_v6, %v2546_v6  ;;  %v1776_v10 = vld [vmem:[%s4093_s1 + $0x38] sm:$0xff]  ;;  %v1773_v11 = vld [vmem:[%s4093_s1 + $0x20] sm:$0xff]  ;;  %v1775_v12 = vld [vmem:[%s4093_s1 + $0x30] sm:$0xff]  ;;  %v1777_v22 = vrot.slane %v2546_v6, 9  ;;  %v1790_v52 = vrot.slane %v2546_v6, 10  ;;  %s2487_s18 = smov 104  }
   0x4   :  { %2113 = vmatprep.subr.bf16.mxu0 %v2112_v4  ;;  %v2116_v13 = vpack.c.bf16 %v1776_v10, %v1774_v7  ;;  %v2567_v14 = vld [vmem:[%s4094_s0 + $0x8] sm:$0xff]  ;;  %v2118_v16 = vpack.c.bf16 %v1775_v12, %v1773_v11  ;;  %v2574_v17 = vld [vmem:[%s4094_s0 + $0x10] sm:$0xff]  ;;  %v1789_v20 = vld [vmem:[%s4093_s1 + $0x58] sm:$0xff]  ;;  %v1803_v27 = vrot.slane %v2546_v6, 11  ;;  %vm1003_vm12 = vcmask 1046528   ;;  %s2490_s21 = smov 80  }
   0x5   :  { %2115 = vmatpush1.bf16.msra.mxu0 %v2114_v8  ;;  %v46_v15 = vcombine.low %v2546_v6, %v2553_v9  ;;  %v185_v18 = vrot.slane %v2553_v9, 5  ;;  %v1787_v19 = vld [vmem:[%s4093_s1 + $0x48] sm:$0xff]  ;;  %v47_v23 = vcombine.low %v2567_v14, %v2574_v17  ;;  %v2589_v24 = vcombine.high %v2574_v17, %v2574_v17  ;;  %v2599_v26 = vld [vmem:[%s4094_s0 + $0x18] sm:$0xff]  ;;  %vm2601_vm3 = vmor %vm180_vm1, %vm181_vm2  ;;  %s2488_s0 = smov 96   ;;  %s2492_s22 = smov 64  }
   0x6   :  { %2117 = vmatprep.subr.bf16.mxu0 %v2116_v13  ;;  %v2120_v21 = vpack.c.bf16 %v1789_v20, %v1787_v19  ;;  %v2593_v25 = vcombine.high %v2567_v14, %v2567_v14  ;;  %v188_v29 = vrot.slane %v2567_v14, 5  ;;  %v1778_v30 = vrot.slane %v2574_v17, 9  ;;  %v1786_v36 = vld [vmem:[%s4093_s1 + $0x40] sm:$0xff]  ;;  %v1788_v37 = vld [vmem:[%s4093_s1 + $0x50] sm:$0xff]  ;;  %v1800_v41 = vld [vmem:[%s4093_s1 + $0x68] sm:$0xff]  ;;  %s2493_s23 = smov 56  }
   0x7   :  { %v187_v28 = vrot.slane %v185_v18, 4  ;;  %v48_v31 = vcombine.low %v2589_v24, %v2599_v26  ;;  %v186_v32 = vsel %vm2601_vm3, %v1777_v22, %v185_v18  ;;  %v195_v38 = vrot.slane %v2589_v24, 5  ;;  %v1802_v42 = vld [vmem:[%s4093_s1 + $0x78] sm:$0xff]  ;;  %vm2646_vm6 = vmor %vm334_vm4, %vm335_vm5  ;;  %v1889_v59 = vld [vmem:[%s4095_s3 + $0x3c8] sm:$0xff]  ;;  %s2494_s24 = smov 48   ;;  %s2495_s25 = smov 40  }
   0x8   :  { %1766 = vmatmul.mubr.msk.f32.vlgmr.msra.gmra.mrb[0].mxu0 %vm49_vm0, %v46_v15  ;;  %v190_v33 = vrot.slane %v188_v29, 4  ;;  %v191_v34 = vrot.slane %v2593_v25, 5  ;;  %v2625_v39 = vcombine.high %v2599_v26, %v2599_v26  ;;  %v198_v40 = vrot.slane %v2599_v26, 5  ;;  %v1891_v60 = vld [vmem:[%s4095_s3 + $0x3d8] sm:$0xff]  ;;  %v1799_v4 = vld [vmem:[%s4093_s1 + $0x60] sm:$0xff]  ;;  %v1801_v5 = vld [vmem:[%s4093_s1 + $0x70] sm:$0xff] }
   0x9   :  { %2119 = vmatpush1.bf16.msra.mxu0 %v2118_v16  ;;  %126 = vmatprep.mubr.f32.mxu0 %v2484_v3  ;;  %v189_v35 = vsel %vm2601_vm3, %v187_v28, %v188_v29  ;;  %v2122_v44 = vpack.c.bf16 %v1788_v37, %v1786_v36  ;;  %v339_v46 = vrot.slane %v2553_v9, 6  ;;  %v196_v47 = vsel %vm2601_vm3, %v1778_v30, %v195_v38  ;;  %v1813_v11 = vld [vmem:[%s4093_s1 + $0x88] sm:$0xff]  ;;  %v1815_v12 = vld [vmem:[%s4093_s1 + $0x98] sm:$0xff]  ;;  %vm2700_vm9 = vmor %vm488_vm7, %vm489_vm8  ;;  %s2496_s26 = smov 32   ;;  %s2497_s27 = smov 24  }
   0xa   :  { %2121 = vmatprep.subr.bf16.mxu0 %v2120_v21  ;;  %v203_v43 = vcombine.low %v186_v32, %v189_v35  ;;  %v192_v45 = vsel %vm2601_vm3, %v190_v33, %v191_v34  ;;  %v197_v48 = vrot.slane %v195_v38, 4  ;;  %v200_v49 = vrot.slane %v198_v40, 4  ;;  %v1812_v37 = vld [vmem:[%s4093_s1 + $0x80] sm:$0xff]  ;;  %v1814_v38 = vld [vmem:[%s4093_s1 + $0x90] sm:$0xff]  ;;  %s2491_s1 = smov 72   ;;  %s2498_s28 = smov 16  }
   0xb   :  { %v201_v50 = vrot.slane %v2625_v39, 5  ;;  %v2124_v51 = vpack.c.bf16 %v1802_v42, %v1800_v41  ;;  %v204_v53 = vcombine.low %v192_v45, %v196_v47  ;;  %v341_v57 = vrot.slane %v339_v46, 4  ;;  %v791_v45 = vld [vmem:[%s4095_s3 + $0x18] sm:$0xff]  ;;  %s2499_s29 = smov 8  }
   0xc   :  { %1767 = vmatmul.mubr.msk.f32.gmra.mrb[2].mxu0 %vm49_vm0, %v47_v23  ;;  %v199_v55 = vsel %vm2601_vm3, %v197_v48, %v198_v40  ;;  %v342_v58 = vrot.slane %v2567_v14, 6  ;;  %v340_v61 = vsel %vm2646_vm6, %v1790_v52, %v339_v46  ;;  %v345_v0 = vrot.slane %v2593_v25, 6 }
   0xd   :  { %132 = vmatprep.mubr.f32.mxu0 %v2484_v3  ;;  %v202_v56 = vsel %vm2601_vm3, %v200_v49, %v201_v50  ;;  %v1791_v1 = vrot.slane %v2574_v17, 10  ;;  %v349_v7 = vrot.slane %v2589_v24, 6  ;;  %v352_v8 = vrot.slane %v2599_v26, 6 }
   0xe   :  { %v205_v62 = vcombine.low %v199_v55, %v202_v56  ;;  %v344_v63 = vrot.slane %v342_v58, 4  ;;  %v343_v2 = vsel %vm2646_vm6, %v341_v57, %v342_v58  ;;  %v2252_v10 = vpack.c.bf16 %v1891_v60, %v1889_v59  ;;  %v788_v56 = vld [vmem:[%s4095_s3] sm:$0xff]  ;;  %v790_v57 = vld [vmem:[%s4095_s3 + $0x10] sm:$0xff]  ;;  %v793_v58 = vld [vmem:[%s4095_s3 + $0x28] sm:$0xff] }
   0xf   :  { %v357_v13 = vcombine.low %v340_v61, %v343_v2  ;;  %v2126_v15 = vpack.c.bf16 %v1801_v5, %v1799_v4  ;;  %v493_v18 = vrot.slane %v2553_v9, 7  ;;  %v350_v19 = vsel %vm2646_vm6, %v1791_v1, %v349_v7  ;;  %v795_v59 = vld [vmem:[%s4095_s3 + $0x38] sm:$0xff]  ;;  %v797_v1 = vld [vmem:[%s4095_s3 + $0x48] sm:$0xff] }
  0x10   :  { %1768 = vmatmul.mubr.msk.f32.gmra.mrb[4].mxu0 %vm49_vm0, %v48_v31  ;;  %2253 = vmatprep.subr.bf16.mxu1 %v2252_v10  ;;  %v346_v16 = vsel %vm2646_vm6, %v344_v63, %v345_v0  ;;  %v351_v20 = vrot.slane %v349_v7, 4  ;;  %v354_v21 = vrot.slane %v352_v8, 4  ;;  %v355_v22 = vrot.slane %v2625_v39, 6  ;;  %v792_v63 = vld [vmem:[%s4095_s3 + $0x20] sm:$0xff]  ;;  %v794_v0 = vld [vmem:[%s4095_s3 + $0x30] sm:$0xff] }
  0x11   :  { %276 = vmatprep.mubr.f32.mxu0 %v2484_v3  ;;  %v2128_v23 = vpack.c.bf16 %v1815_v12, %v1813_v11  ;;  %v358_v28 = vcombine.low %v346_v16, %v350_v19  ;;  %v495_v29 = vrot.slane %v493_v18, 4  ;;  %v496_v30 = vrot.slane %v2567_v14, 7  ;;  %v796_v7 = vld [vmem:[%s4095_s3 + $0x40] sm:$0xff]  ;;  %v1890_v11 = vld [vmem:[%s4095_s3 + $0x3d0] sm:$0xff]  ;;  %v1893_v16 = vld [vmem:[%s4095_s3 + $0x3e8] sm:$0xff] }
  0x12   :  { %v353_v31 = vsel %vm2646_vm6, %v351_v20, %v352_v8  ;;  %v356_v32 = vsel %vm2646_vm6, %v354_v21, %v355_v22  ;;  %v494_v34 = vsel %vm2700_vm9, %v1803_v27, %v493_v18  ;;  %v499_v40 = vrot.slane %v2593_v25, 7  ;;  %v798_v8 = vld [vmem:[%s4095_s3 + $0x50] sm:$0xff]  ;;  %v1895_v19 = vld [vmem:[%s4095_s3 + $0x3f8] sm:$0xff]  ;;  %v1892_v20 = vld [vmem:[%s4095_s3 + $0x3e0] sm:$0xff] }
  0x13   :  { %v359_v6 = vcombine.low %v353_v31, %v356_v32  ;;  %v497_v35 = vsel %vm2700_vm9, %v495_v29, %v496_v30  ;;  %v498_v36 = vrot.slane %v496_v30, 4  ;;  %v1804_v41 = vrot.slane %v2574_v17, 11  ;;  %v1894_v22 = vld [vmem:[%s4095_s3 + $0x3f0] sm:$0xff]  ;;  %v805_v27 = vld [vmem:[%s4095_s3 + $0x88] sm:$0xff]  ;;  %v804_v30 = vld [vmem:[%s4095_s3 + $0x80] sm:$0xff] }
  0x14   :  { %1779 = vmatmul.mubr.msk.f32.vlgmr.msra.gmra.mrb[0].mxu0 %vm49_vm0, %v203_v43  ;;  %v503_v42 = vrot.slane %v2589_v24, 7  ;;  %v506_v43 = vrot.slane %v2599_v26, 7  ;;  %v511_v46 = vcombine.low %v494_v34, %v497_v35  ;;  %v2130_v47 = vpack.c.bf16 %v1814_v38, %v1812_v37  ;;  %v806_v31 = vld [vmem:[%s4095_s3 + $0x90] sm:$0xff]  ;;  %v1897_v32 = vld [vmem:[%s4095_s3 + $0x408] sm:$0xff]  ;;  %v1896_v34 = vld [vmem:[%s4095_s3 + $0x400] sm:$0xff] }
  0x15   :  { %2123 = vmatpush1.bf16.msra.mxu0 %v2122_v44  ;;  %282 = vmatprep.mubr.f32.mxu0 %v2484_v3  ;;  %v789_v44 = vld [vmem:[%s4095_s3 + $0x8] sm:$0xff]  ;;  %v509_v25 = vrot.slane %v2625_v39, 7  ;;  %v500_v24 = vsel %vm2700_vm9, %v498_v36, %v499_v40  ;;  %v642_v60 = vcombine.low %v2553_v9, %v2567_v14  ;;  %v2134_v61 = vpack.c.bf16 %v790_v57, %v788_v56  ;;  %v799_v9 = vld [vmem:[%s4095_s3 + $0x58] sm:$0xff]  ;;  %v1898_v35 = vld [vmem:[%s4095_s3 + $0x410] sm:$0xff] }
  0x16   :  { %2125 = vmatprep.subr.bf16.mxu0 %v2124_v51  ;;  %v504_v48 = vsel %vm2700_vm9, %v1804_v41, %v503_v42  ;;  %v505_v49 = vrot.slane %v503_v42, 4  ;;  %v508_v50 = vrot.slane %v506_v43, 4  ;;  %v2132_v51 = vpack.c.bf16 %v791_v45, %v789_v44  ;;  %v809_v38 = vld [vmem:[%s4095_s3 + $0xa8] sm:$0xff]  ;;  %v811_v40 = vld [vmem:[%s4095_s3 + $0xb8] sm:$0xff]  ;;  %v808_v42 = vld [vmem:[%s4095_s3 + $0xa0] sm:$0xff] }
  0x17   :  { %v512_v52 = vcombine.low %v500_v24, %v504_v48  ;;  %v1816_v2 = vcombine.high %v2567_v14, %v2574_v17  ;;  %v2138_v4 = vpack.c.bf16 %v794_v0, %v792_v63  ;;  %v2140_v5 = vpack.c.bf16 %v799_v9, %v797_v1  ;;  %v1888_v17 = vld [vmem:[%s4095_s3 + $0x3c0] sm:$0xff]  ;;  %v1901_v44 = vld [vmem:[%s4095_s3 + $0x428] sm:$0xff]  ;;  %v1907_v56 = vld [vmem:[%s4095_s3 + $0x458] sm:$0xff] }
  0x18   :  { %1780 = vmatmul.mubr.msk.f32.gmra.mrb[6].mxu0 %vm49_vm0, %v204_v53  ;;  %v507_v53 = vsel %vm2700_vm9, %v505_v49, %v506_v43  ;;  %v510_v54 = vsel %vm2700_vm9, %v508_v50, %v509_v25  ;;  %v644_v10 = vcombine.low %v2599_v26, %v2625_v39  ;;  %v2142_v14 = vpack.c.bf16 %v798_v8, %v796_v7  ;;  %v801_v26 = vld [vmem:[%s4095_s3 + $0x68] sm:$0xff]  ;;  %v810_v43 = vld [vmem:[%s4095_s3 + $0xb0] sm:$0xff]  ;;  %v815_v50 = vld [vmem:[%s4095_s3 + $0xd8] sm:$0xff] }
  0x19   :  { %288 = vmatprep.mubr.f32.mxu0 %v2484_v3  ;;  %v513_v55 = vcombine.low %v507_v53, %v510_v54  ;;  %v2254_v12 = vpack.c.bf16 %v1890_v11, %v1888_v17  ;;  %v2256_v21 = vpack.c.bf16 %v1895_v19, %v1893_v16  ;;  %v2150_v33 = vpack.c.bf16 %v806_v31, %v804_v30  ;;  %v1902_v25 = vld [vmem:[%s4095_s3 + $0x430] sm:$0xff]  ;;  %v813_v49 = vld [vmem:[%s4095_s3 + $0xc8] sm:$0xff]  ;;  %v1904_v57 = vld [vmem:[%s4095_s3 + $0x440] sm:$0xff] }
  0x1a   :  { %v2262_v37 = vpack.c.bf16 %v1898_v35, %v1896_v34  ;;  %v2152_v41 = vpack.c.bf16 %v811_v40, %v809_v38  ;;  %v2154_v45 = vpack.c.bf16 %v810_v43, %v808_v42  ;;  %v814_v53 = vld [vmem:[%s4095_s3 + $0xd0] sm:$0xff]  ;;  %v1905_v54 = vld [vmem:[%s4095_s3 + $0x448] sm:$0xff]  ;;  %v816_v0 = vld [vmem:[%s4095_s3 + $0xe0] sm:$0xff]  ;;  %vm1325_vm13 = vcmask 1044480  }
  0x1b   :  { %2255 = vmatpush1.bf16.msra.mxu1 %v2254_v12  ;;  %v818_v1 = vld [vmem:[%s4095_s3 + $0xf0] sm:$0xff]  ;;  %v1909_v9 = vld [vmem:[%s4095_s3 + $0x468] sm:$0xff]  ;;  %v823_v17 = vld [vmem:[%s4095_s3 + $0x118] sm:$0xff]  ;;  %vm1486_vm14 = vcmask 1043456   ;;  %vm1590_vm15 = vcmask 64512  }
  0x1c   :  { %1781 = vmatmul.mubr.msk.f32.gmra.mrb[8].mxu0 %vm49_vm0, %v205_v62  ;;  %v2136_v62 = vpack.c.bf16 %v795_v59, %v793_v58  ;;  %2257 = vmatprep.subr.bf16.mxu1 %v2256_v21  ;;  %v1906_v58 = vld [vmem:[%s4095_s3 + $0x450] sm:$0xff]  ;;  %v2268_v59 = vpack.c.bf16 %v1907_v56, %v1905_v54  ;;  %v820_v12 = vld [vmem:[%s4095_s3 + $0x100] sm:$0xff]  ;;  %v827_v21 = vld [vmem:[%s4095_s3 + $0x138] sm:$0xff] }
  0x1d   :  { %430 = vmatprep.mubr.f32.mxu0 %v2484_v3  ;;  %v1910_v7 = vld [vmem:[%s4095_s3 + $0x470] sm:$0xff]  ;;  %v1919_v30 = vld [vmem:[%s4095_s3 + $0x4b8] sm:$0xff]  ;;  %v1916_v31 = vld [vmem:[%s4095_s3 + $0x4a0] sm:$0xff] }
  0x1e   :  { %v1914_v16 = vld [vmem:[%s4095_s3 + $0x490] sm:$0xff]  ;;  %v829_v34 = vld [vmem:[%s4095_s3 + $0x148] sm:$0xff]  ;;  %v831_v35 = vld [vmem:[%s4095_s3 + $0x158] sm:$0xff] }
  0x1f   :  { %v830_v38 = vld [vmem:[%s4095_s3 + $0x150] sm:$0xff]  ;;  %v1921_v40 = vld [vmem:[%s4095_s3 + $0x4c8] sm:$0xff]  ;;  %v1923_v42 = vld [vmem:[%s4095_s3 + $0x4d8] sm:$0xff] }
  0x20   :  { %1792 = vmatmul.mubr.msk.f32.vlgmr.msra.gmra.mrb[0].mxu0 %vm49_vm0, %v357_v13  ;;  %v800_v13 = vld [vmem:[%s4095_s3 + $0x60] sm:$0xff]  ;;  %v1926_v54 = vld [vmem:[%s4095_s3 + $0x4f0] sm:$0xff] }
  0x21   :  { %2127 = vmatpush1.bf16.msra.mxu0 %v2126_v15  ;;  %436 = vmatprep.mubr.f32.mxu0 %v2484_v3  ;;  %v802_v15 = vld [vmem:[%s4095_s3 + $0x70] sm:$0xff]  ;;  %v1920_v43 = vld [vmem:[%s4095_s3 + $0x4c0] sm:$0xff] }
  0x22   :  { %2129 = vmatprep.subr.bf16.mxu0 %v2128_v23  ;;  %v2146_v18 = vpack.c.bf16 %v802_v15, %v800_v13  ;;  %v2258_v23 = vpack.c.bf16 %v1894_v22, %v1892_v20  ;;  %v1915_v13 = vld [vmem:[%s4095_s3 + $0x498] sm:$0xff]  ;;  %v1912_v15 = vld [vmem:[%s4095_s3 + $0x480] sm:$0xff]  ;;  %v825_v20 = vld [vmem:[%s4095_s3 + $0x128] sm:$0xff] }
  0x23   :  { %v2278_v19 = vpack.c.bf16 %v1914_v16, %v1912_v15  ;;  %v2168_v22 = vpack.c.bf16 %v827_v21, %v825_v20  ;;  %v845_v15 = vld [vmem:[%s4095_s3 + $0x1c8] sm:$0xff]  ;;  %v847_v16 = vld [vmem:[%s4095_s3 + $0x1d8] sm:$0xff]  ;;  %v846_v20 = vld [vmem:[%s4095_s3 + $0x1d0] sm:$0xff] }
  0x24   :  { %1793 = vmatmul.mubr.msk.f32.gmra.mrb[10].mxu0 %vm49_vm0, %v358_v28  ;;  %v807_v28 = vld [vmem:[%s4095_s3 + $0x98] sm:$0xff]  ;;  %2259 = vmatpush1.bf16.msra.mxu1 %v2258_v23  ;;  %v824_v23 = vld [vmem:[%s4095_s3 + $0x120] sm:$0xff]  ;;  %v1937_v21 = vld [vmem:[%s4095_s3 + $0x548] sm:$0xff] }
  0x25   :  { %442 = vmatprep.mubr.f32.mxu0 %v2484_v3  ;;  %v2148_v29 = vpack.c.bf16 %v807_v28, %v805_v27  ;;  %v826_v27 = vld [vmem:[%s4095_s3 + $0x130] sm:$0xff]  ;;  %v1917_v28 = vld [vmem:[%s4095_s3 + $0x4a8] sm:$0xff] }
  0x28   :  { %1794 = vmatmul.mubr.msk.f32.gmra.mrb[12].mxu0 %vm49_vm0, %v359_v6  ;;  %v1899_v6 = vld [vmem:[%s4095_s3 + $0x418] sm:$0xff] }
  0x29   :  { %584 = vmatprep.mubr.f32.mxu0 %v2484_v3  ;;  %v2260_v36 = vpack.c.bf16 %v1899_v6, %v1897_v32  ;;  %v1918_v32 = vld [vmem:[%s4095_s3 + $0x4b0] sm:$0xff] }
  0x2a   :  { %v2282_v6 = vpack.c.bf16 %v1918_v32, %v1916_v31  ;;  %v1827_v31 = vld [vmem:[%s4095_s3 + $0x1e8] sm:$0xff]  ;;  %v1829_v32 = vld [vmem:[%s4095_s3 + $0x1f8] sm:$0xff] }
  0x2b   :  { %2261 = vmatprep.subr.bf16.mxu1 %v2260_v36  ;;  %v2172_v36 = vpack.c.bf16 %v831_v35, %v829_v34  ;;  %v1943_v34 = vld [vmem:[%s4095_s3 + $0x578] sm:$0xff] }
  0x2c   :  { %1805 = vmatmul.mubr.msk.f32.vlgmr.msra.gmra.mrb[0].mxu0 %vm49_vm0, %v511_v46  ;;  %2263 = vmatpush1.bf16.msra.mxu1 %v2262_v37  ;;  %v1903_v46 = vld [vmem:[%s4095_s3 + $0x438] sm:$0xff]  ;;  %v828_v37 = vld [vmem:[%s4095_s3 + $0x140] sm:$0xff] }
  0x2d   :  { %2131 = vmatpush1.bf16.msra.mxu0 %v2130_v47  ;;  %590 = vmatprep.mubr.f32.mxu0 %v2484_v3  ;;  %v1900_v47 = vld [vmem:[%s4095_s3 + $0x420] sm:$0xff]  ;;  %v2264_v24 = vpack.c.bf16 %v1903_v46, %v1901_v44  ;;  %v1922_v44 = vld [vmem:[%s4095_s3 + $0x4d0] sm:$0xff] }
  0x2e   :  { %2133 = vmatprep.subr.bf16.mxu0 %v2132_v51  ;;  %v2266_v48 = vpack.c.bf16 %v1902_v25, %v1900_v47  ;;  %v2156_v51 = vpack.c.bf16 %v815_v50, %v813_v49  ;;  %v2286_v46 = vpack.c.bf16 %v1922_v44, %v1920_v43  ;;  %v833_v47 = vld [vmem:[%s4095_s3 + $0x168] sm:$0xff]  ;;  %v835_v25 = vld [vmem:[%s4095_s3 + $0x178] sm:$0xff]  ;;  %v834_v49 = vld [vmem:[%s4095_s3 + $0x170] sm:$0xff] }
  0x2f   :  { %2265 = vmatprep.subr.bf16.mxu1 %v2264_v24  ;;  %v2176_v24 = vpack.c.bf16 %v835_v25, %v833_v47  ;;  %v1925_v50 = vld [vmem:[%s4095_s3 + $0x4e8] sm:$0xff]  ;;  %v1946_v43 = vld [vmem:[%s4095_s3 + $0x590] sm:$0xff]  ;;  %v1953_v47 = vld [vmem:[%s4095_s3 + $0x5b8] sm:$0xff] }
  0x30   :  { %1806 = vmatmul.mubr.msk.f32.gmra.mrb[14].mxu0 %vm49_vm0, %v512_v52  ;;  %v812_v52 = vld [vmem:[%s4095_s3 + $0xc0] sm:$0xff]  ;;  %2267 = vmatpush1.bf16.msra.mxu1 %v2266_v48 }
  0x31   :  { %596 = vmatprep.mubr.f32.mxu0 %v2484_v3  ;;  %2269 = vmatprep.subr.bf16.mxu1 %v2268_v59  ;;  %v832_v48 = vld [vmem:[%s4095_s3 + $0x160] sm:$0xff] }
  0x34   :  { %1807 = vmatmul.mubr.msk.f32.gmra.mrb[16].mxu0 %vm49_vm0, %v513_v55  ;;  %v2158_v55 = vpack.c.bf16 %v814_v53, %v812_v52  ;;  %v1927_v52 = vld [vmem:[%s4095_s3 + $0x4f8] sm:$0xff]  ;;  %v1924_v53 = vld [vmem:[%s4095_s3 + $0x4e0] sm:$0xff] }
  0x35   :  { %715 = vmatprep.mubr.f32.mxu0 %v2484_v3  ;;  %v2290_v56 = vpack.c.bf16 %v1926_v54, %v1924_v53 }
  0x38   :  { %1817 = vmatmul.mubr.msk.f32.vlgmr.msra.gmra.mrb[0].mxu0 %vm49_vm0, %v642_v60  ;;  %v2270_v60 = vpack.c.bf16 %v1906_v58, %v1904_v57  ;;  %v837_v57 = vld [vmem:[%s4095_s3 + $0x188] sm:$0xff]  ;;  %v839_v58 = vld [vmem:[%s4095_s3 + $0x198] sm:$0xff] }
  0x39   :  { %721 = vmatprep.mubr.f32.mxu0 %v2484_v3  ;;  %2135 = vmatpush1.bf16.msra.mxu0 %v2134_v61  ;;  %v817_v61 = vld [vmem:[%s4095_s3 + $0xe8] sm:$0xff]  ;;  %v2180_v59 = vpack.c.bf16 %v839_v58, %v837_v57  ;;  %v24_v58 = vld [vmem:[%s4096_s2] sm:$0x3]  ;;  %s2489_s2 = smov 88  }
  0x3a   :  { %2137 = vmatprep.subr.bf16.mxu0 %v2136_v62  ;;  %v819_v62 = vld [vmem:[%s4095_s3 + $0xf8] sm:$0xff]  ;;  %2271 = vmatpush1.bf16.msra.mxu1 %v2270_v60  ;;  %v836_v60 = vld [vmem:[%s4095_s3 + $0x180] sm:$0xff] }
  0x3b   :  { %v2160_v63 = vpack.c.bf16 %v819_v62, %v817_v61  ;;  %v838_v61 = vld [vmem:[%s4095_s3 + $0x190] sm:$0xff]  ;;  %v1929_v62 = vld [vmem:[%s4095_s3 + $0x508] sm:$0xff] }
  0x3c   :  { %1818 = vmatmul.mubr.msk.f32.gmra.mrb[18].mxu0 %vm49_vm0, %v1816_v2  ;;  %v2162_v2 = vpack.c.bf16 %v818_v1, %v816_v0  ;;  %v1931_v0 = vld [vmem:[%s4095_s3 + $0x518] sm:$0xff]  ;;  %v1928_v1 = vld [vmem:[%s4095_s3 + $0x500] sm:$0xff] }
  0x3d   :  { %727 = vmatprep.mubr.f32.mxu0 %v2484_v3  ;;  %2139 = vmatpush1.bf16.msra.mxu0 %v2138_v4  ;;  %v803_v3 = vld [vmem:[%s4095_s3 + $0x78] sm:$0xff] }
  0x3e   :  { %2141 = vmatprep.subr.bf16.mxu0 %v2140_v5  ;;  %v2144_v39 = vpack.c.bf16 %v803_v3, %v801_v26  ;;  %v1911_v4 = vld [vmem:[%s4095_s3 + $0x478] sm:$0xff]  ;;  %v1908_v5 = vld [vmem:[%s4095_s3 + $0x460] sm:$0xff]  ;;  %v822_v26 = vld [vmem:[%s4095_s3 + $0x110] sm:$0xff] }
  0x3f   :  { %v2272_v8 = vpack.c.bf16 %v1911_v4, %v1909_v9  ;;  %v1913_v3 = vld [vmem:[%s4095_s3 + $0x488] sm:$0xff]  ;;  %v1930_v9 = vld [vmem:[%s4095_s3 + $0x510] sm:$0xff] }
  0x40   :  { %1819 = vmatmul.mubr.msk.f32.gmra.mrb[20].mxu0 %vm49_vm0, %v644_v10  ;;  %v2274_v10 = vpack.c.bf16 %v1910_v7, %v1908_v5  ;;  %v2294_v4 = vpack.c.bf16 %v1930_v9, %v1928_v1  ;;  %v841_v5 = vld [vmem:[%s4095_s3 + $0x1a8] sm:$0xff]  ;;  %v843_v7 = vld [vmem:[%s4095_s3 + $0x1b8] sm:$0xff] }
  0x41   :  { %2143 = vmatpush1.bf16.msra.mxu0 %v2142_v14  ;;  %v821_v14 = vld [vmem:[%s4095_s3 + $0x108] sm:$0xff]  ;;  %2273 = vmatprep.subr.bf16.mxu1 %v2272_v8  ;;  %v2184_v8 = vpack.c.bf16 %v843_v7, %v841_v5 }
  0x42   :  { %2145 = vmatprep.subr.bf16.mxu0 %v2144_v39  ;;  %v2164_v11 = vpack.c.bf16 %v823_v17, %v821_v14  ;;  %2275 = vmatpush1.bf16.msra.mxu1 %v2274_v10  ;;  %v2166_v39 = vpack.c.bf16 %v822_v26, %v820_v12  ;;  %v840_v10 = vld [vmem:[%s4095_s3 + $0x1a0] sm:$0xff]  ;;  %v842_v14 = vld [vmem:[%s4095_s3 + $0x1b0] sm:$0xff]  ;;  %v1933_v17 = vld [vmem:[%s4095_s3 + $0x528] sm:$0xff] }
  0x43   :  { %v1935_v12 = vld [vmem:[%s4095_s3 + $0x538] sm:$0xff]  ;;  %v1932_v26 = vld [vmem:[%s4095_s3 + $0x520] sm:$0xff] }
  0x45   :  { %2147 = vmatpush1.bf16.msra.mxu0 %v2146_v18  ;;  %v2276_v18 = vpack.c.bf16 %v1915_v13, %v1913_v3  ;;  %v1934_v3 = vld [vmem:[%s4095_s3 + $0x530] sm:$0xff] }
  0x46   :  { %2149 = vmatprep.subr.bf16.mxu0 %v2148_v29  ;;  %v2170_v29 = vpack.c.bf16 %v826_v27, %v824_v23  ;;  %v2298_v13 = vpack.c.bf16 %v1934_v3, %v1932_v26  ;;  %v1939_v23 = vld [vmem:[%s4095_s3 + $0x558] sm:$0xff]  ;;  %v1936_v27 = vld [vmem:[%s4095_s3 + $0x540] sm:$0xff] }
  0x47   :  { %2277 = vmatprep.subr.bf16.mxu1 %v2276_v18  ;;  %v2188_v18 = vpack.c.bf16 %v847_v16, %v845_v15 }
  0x48   :  { %2279 = vmatpush1.bf16.msra.mxu1 %v2278_v19  ;;  %v844_v19 = vld [vmem:[%s4095_s3 + $0x1c0] sm:$0xff] }
  0x49   :  { %2151 = vmatpush1.bf16.msra.mxu0 %v2150_v33  ;;  %v2280_v33 = vpack.c.bf16 %v1919_v30, %v1917_v28  ;;  %v1938_v28 = vld [vmem:[%s4095_s3 + $0x550] sm:$0xff] }
  0x4a   :  { %2153 = vmatprep.subr.bf16.mxu0 %v2152_v41  ;;  %v2174_v41 = vpack.c.bf16 %v830_v38, %v828_v37  ;;  %v2302_v30 = vpack.c.bf16 %v1938_v28, %v1936_v27  ;;  %v1942_v37 = vld [vmem:[%s4095_s3 + $0x570] sm:$0xff] }
  0x4b   :  { %2281 = vmatprep.subr.bf16.mxu1 %v2280_v33  ;;  %v2192_v33 = vpack.c.bf16 %v1829_v32, %v1827_v31 }
  0x4c   :  { %2283 = vmatpush1.bf16.msra.mxu1 %v2282_v6  ;;  %v1941_v6 = vld [vmem:[%s4095_s3 + $0x568] sm:$0xff] }
  0x4d   :  { %2155 = vmatpush1.bf16.msra.mxu0 %v2154_v45  ;;  %v2284_v45 = vpack.c.bf16 %v1923_v42, %v1921_v40  ;;  %v2304_v35 = vpack.c.bf16 %v1943_v34, %v1941_v6  ;;  %v1945_v40 = vld [vmem:[%s4095_s3 + $0x588] sm:$0xff]  ;;  %v1944_v42 = vld [vmem:[%s4095_s3 + $0x580] sm:$0xff] }
  0x4e   :  { %2157 = vmatprep.subr.bf16.mxu0 %v2156_v51  ;;  %v2178_v51 = vpack.c.bf16 %v834_v49, %v832_v48 }
  0x4f   :  { %2285 = vmatprep.subr.bf16.mxu1 %v2284_v45  ;;  %v2310_v45 = vpack.c.bf16 %v1946_v43, %v1944_v42 }
  0x50   :  { %2287 = vmatpush1.bf16.msra.mxu1 %v2286_v46  ;;  %v1951_v46 = vld [vmem:[%s4095_s3 + $0x5a8] sm:$0xff] }
  0x51   :  { %2159 = vmatpush1.bf16.msra.mxu0 %v2158_v55  ;;  %v2288_v55 = vpack.c.bf16 %v1927_v52, %v1925_v50  ;;  %v2312_v25 = vpack.c.bf16 %v1953_v47, %v1951_v46 }
  0x52   :  { %2161 = vmatprep.subr.bf16.mxu0 %v2160_v63  ;;  %v2182_v63 = vpack.c.bf16 %v838_v61, %v836_v60 }
  0x53   :  { %2289 = vmatprep.subr.bf16.mxu1 %v2288_v55 }
  0x54   :  { %2291 = vmatpush1.bf16.msra.mxu1 %v2290_v56 }
  0x55   :  { %2163 = vmatpush1.bf16.msra.mxu0 %v2162_v2  ;;  %v2292_v2 = vpack.c.bf16 %v1931_v0, %v1929_v62 }
  0x56   :  { %2165 = vmatprep.subr.bf16.mxu0 %v2164_v11  ;;  %v2186_v11 = vpack.c.bf16 %v842_v14, %v840_v10 }
  0x57   :  { %2293 = vmatprep.subr.bf16.mxu1 %v2292_v2 }
  0x58   :  { %2295 = vmatpush1.bf16.msra.mxu1 %v2294_v4 }
  0x59   :  { %2167 = vmatpush1.bf16.msra.mxu0 %v2166_v39  ;;  %v2296_v39 = vpack.c.bf16 %v1935_v12, %v1933_v17 }
  0x5a   :  { %2169 = vmatprep.subr.bf16.mxu0 %v2168_v22  ;;  %v2190_v22 = vpack.c.bf16 %v846_v20, %v844_v19 }
  0x5b   :  { %2297 = vmatprep.subr.bf16.mxu1 %v2296_v39 }
  0x5c   :  { %2299 = vmatpush1.bf16.msra.mxu1 %v2298_v13 }
  0x5d   :  { %2171 = vmatpush1.bf16.msra.mxu0 %v2170_v29  ;;  %v2300_v29 = vpack.c.bf16 %v1939_v23, %v1937_v21 }
  0x5e   :  { %2173 = vmatprep.subr.bf16.mxu0 %v2172_v36  ;;  %v1940_v36 = vld [vmem:[%s4095_s3 + $0x560] sm:$0xff] }
  0x5f   :  { %2301 = vmatprep.subr.bf16.mxu1 %v2300_v29  ;;  %v2306_v38 = vpack.c.bf16 %v1942_v37, %v1940_v36 }
  0x60   :  { %2303 = vmatpush1.bf16.msra.mxu1 %v2302_v30 }
  0x61   :  { %2175 = vmatpush1.bf16.msra.mxu0 %v2174_v41  ;;  %2305 = vmatprep.subr.bf16.mxu1 %v2304_v35  ;;  %v1947_v41 = vld [vmem:[%s4095_s3 + $0x598] sm:$0xff] }
  0x62   :  { %2177 = vmatprep.subr.bf16.mxu0 %v2176_v24  ;;  %v2308_v44 = vpack.c.bf16 %v1947_v41, %v1945_v40  ;;  %v26_v24 = vlaneseq }
  0x64   :  { %2307 = vmatpush1.bf16.msra.mxu1 %v2306_v38  ;;  %v3114_v49 = vshrl.u32 %v26_v24, 7 }
  0x65   :  { %2179 = vmatpush1.bf16.msra.mxu0 %v2178_v51  ;;  %2309 = vmatprep.subr.bf16.mxu1 %v2308_v44 }
  0x66   :  { %2181 = vmatprep.subr.bf16.mxu0 %v2180_v59  ;;  %v4100_v54 = vsub.s32 0, %v3114_v49  ;;  %v4099_v55 = vsub.s32 1, %v3114_v49 }
  0x68   :  { %2311 = vmatpush1.bf16.msra.mxu1 %v2310_v45  ;;  %v3123_v62 = vrot.slane %v24_v58, %v4100_v54 }
  0x69   :  { %2183 = vmatpush1.bf16.msra.mxu0 %v2182_v63  ;;  %2313 = vmatprep.subr.bf16.mxu1 %v2312_v25  ;;  %v3127_v63 = vrot.slane %v24_v58, %v4099_v55 }
  0x6a   :  { %2185 = vmatprep.subr.bf16.mxu0 %v2184_v8 }
  0x6d   :  { %2187 = vmatpush1.bf16.msra.mxu0 %v2186_v11 }
  0x6e   :  { %2189 = vmatprep.subr.bf16.mxu0 %v2188_v18 }
  0x71   :  { %2191 = vmatpush1.bf16.msra.mxu0 %v2190_v22 }
  0x72   :  { %2193 = vmatprep.subr.bf16.mxu0 %v2192_v33 }
  0xdf   :  { %v128_v48 = vpop.f32.mrb[2].mxu0 }
  0xe0   :  { %v130_v50 = vpop.f32.mrb[3].mxu0 }
  0xe1   :  { %v147_v51 = vcombine.low %v128_v48, %v130_v50  ;;  %v148_v52 = vcombine.high %v128_v48, %v130_v50  ;;  %v1769_v0 = vcombine.low %v130_v50, %v130_v50 }
  0xe3   :  { %v134_v53 = vpop.f32.mrb[4].mxu0  ;;  %v167_v9 = vadd.f32 %v147_v51, %v3123_v62  ;;  %v168_v2 = vadd.f32 %v1769_v0, %v3127_v63  ;;  %v3167_v0 = vld [vmem:[%s4095_s3 + $0x210] sm:$0xff] }
  0xe4   :  { %v1770_v56 = vcombine.low %v148_v52, %v134_v53  ;;  %v136_v57 = vpop.f32.mrb[5].mxu0 }
  0xe5   :  { %v149_v59 = vcombine.low %v134_v53, %v136_v57  ;;  %v150_v60 = vcombine.high %v134_v53, %v136_v57  ;;  %v1772_v5 = vcombine.high %v136_v57, %v136_v57  ;;  %v3142_v53 = vld [vmem:[%s4095_s3 + $0x1e0] sm:$0xff] }
  0xe6   :  { %v169_v12 = vadd.f32 %v1770_v56, %v3123_v62  ;;  %v3147_v56 = vld [vmem:[%s4095_s3 + $0x1f0] sm:$0xff] }
  0xe7   :  { %v1771_v61 = vcombine.high %v130_v50, %v149_v59  ;;  %v171_v26 = vadd.f32 %v150_v60, %v3123_v62  ;;  %v172_v13 = vadd.f32 %v1772_v5, %v3127_v63  ;;  %v3152_v59 = vld [vmem:[%s4095_s3 + $0x208] sm:$0xff]  ;;  %v3157_v60 = vld [vmem:[%s4095_s3 + $0x218] sm:$0xff] }
  0xe8   :  { %v3177_v5 = vld [vmem:[%s4095_s3 + $0x238] sm:$0xff] }
  0xe9   :  { %v170_v20 = vadd.f32 %v1771_v61, %v3127_v63  ;;  %v3162_v61 = vld [vmem:[%s4095_s3 + $0x200] sm:$0xff] }
  0xeb   :  { %v284_v1 = vpop.f32.mrb[6].mxu0 }
  0xec   :  { %v286_v4 = vpop.f32.mrb[7].mxu0 }
  0xed   :  { %v303_v7 = vcombine.low %v284_v1, %v286_v4  ;;  %v1782_v8 = vcombine.low %v286_v4, %v286_v4  ;;  %v304_v10 = vcombine.high %v284_v1, %v286_v4 }
  0xef   :  { %v323_v14 = vadd.f32 %v303_v7, %v167_v9  ;;  %v324_v17 = vadd.f32 %v1782_v8, %v168_v2  ;;  %v290_v11 = vpop.f32.mrb[8].mxu0  ;;  %v3182_v7 = vld [vmem:[%s4095_s3 + $0x220] sm:$0xff]  ;;  %v3187_v8 = vld [vmem:[%s4095_s3 + $0x230] sm:$0xff] }
  0xf0   :  { %v1783_v3 = vcombine.low %v304_v10, %v290_v11  ;;  %v292_v39 = vpop.f32.mrb[9].mxu0 }
  0xf1   :  { %v305_v15 = vcombine.low %v290_v11, %v292_v39  ;;  %v306_v16 = vcombine.high %v290_v11, %v292_v39  ;;  %v1785_v18 = vcombine.high %v292_v39, %v292_v39  ;;  %v3204_v11 = vld [vmem:[%s4095_s3 + $0x248] sm:$0xff] }
  0xf2   :  { %v325_v19 = vadd.f32 %v1783_v3, %v169_v12  ;;  %v3209_v12 = vld [vmem:[%s4095_s3 + $0x258] sm:$0xff]  ;;  %v3219_v3 = vld [vmem:[%s4095_s3 + $0x250] sm:$0xff] }
  0xf3   :  { %v1784_v21 = vcombine.high %v286_v4, %v305_v15  ;;  %v327_v22 = vadd.f32 %v306_v16, %v171_v26  ;;  %v328_v23 = vadd.f32 %v1785_v18, %v172_v13  ;;  %v3172_v4 = vld [vmem:[%s4095_s3 + $0x228] sm:$0xff]  ;;  %v3214_v26 = vld [vmem:[%s4095_s3 + $0x240] sm:$0xff] }
  0xf4   :  { %v3228_v18 = vld [vmem:[%s4095_s3 + $0x5c8] sm:$0xff] }
  0xf5   :  { %v326_v27 = vadd.f32 %v1784_v21, %v170_v20  ;;  %v3238_v20 = vld [vmem:[%s4095_s3 + $0x5c0] sm:$0xff]  ;;  %v3243_v21 = vld [vmem:[%s4095_s3 + $0x5d0] sm:$0xff] }
  0xf7   :  { %v438_v28 = vpop.f32.mrb[10].mxu0 }
  0xf8   :  { %v440_v29 = vpop.f32.mrb[11].mxu0 }
  0xf9   :  { %v457_v30 = vcombine.low %v438_v28, %v440_v29  ;;  %v1795_v31 = vcombine.low %v440_v29, %v440_v29  ;;  %v458_v32 = vcombine.high %v438_v28, %v440_v29  ;;  %v3251_v28 = vld [vmem:[%s4095_s3 + $0x268] sm:$0xff] }
  0xfb   :  { %v477_v33 = vadd.f32 %v457_v30, %v323_v14  ;;  %v478_v6 = vadd.f32 %v1795_v31, %v324_v17  ;;  %v444_v34 = vpop.f32.mrb[12].mxu0  ;;  %v3194_v14 = vld [vmem:[%s4095_s3 + $0x5a0] sm:$0xff]  ;;  %v3199_v17 = vld [vmem:[%s4095_s3 + $0x5b0] sm:$0xff] }
  0xfc   :  { %v1796_v35 = vcombine.low %v458_v32, %v444_v34  ;;  %v446_v36 = vpop.f32.mrb[13].mxu0  ;;  %v3261_v30 = vld [vmem:[%s4095_s3 + $0x260] sm:$0xff]  ;;  %v2196_v32 = vpack.c.bf16 %v3157_v60, %v3152_v59 }
  0xfd   :  { %v459_v37 = vcombine.low %v444_v34, %v446_v36  ;;  %v460_v38 = vcombine.high %v444_v34, %v446_v36  ;;  %v1798_v40 = vcombine.high %v446_v36, %v446_v36  ;;  %v3278_v34 = vld [vmem:[%s4095_s3 + $0x5e8] sm:$0xff]  ;;  %v2200_v36 = vpack.c.bf16 %v3177_v5, %v3172_v4 }
  0xfe   :  { %v479_v41 = vadd.f32 %v1796_v35, %v325_v19  ;;  %v3233_v19 = vld [vmem:[%s4095_s3 + $0x5d8] sm:$0xff] }
  0xff   :  { %v1797_v42 = vcombine.high %v440_v29, %v459_v37  ;;  %v481_v43 = vadd.f32 %v460_v38, %v327_v22  ;;  %v482_v44 = vadd.f32 %v1798_v40, %v328_v23  ;;  %v3256_v29 = vld [vmem:[%s4095_s3 + $0x278] sm:$0xff]  ;;  %v2202_v37 = vpack.c.bf16 %v3187_v8, %v3182_v7  ;;  %v3294_v38 = vld [vmem:[%s4095_s3 + $0x5e0] sm:$0xff]  ;;  %v3299_v40 = vld [vmem:[%s4095_s3 + $0x5f0] sm:$0xff] }
 0x101   :  { %v480_v45 = vadd.f32 %v1797_v42, %v326_v27  ;;  %v2194_v27 = vpack.c.bf16 %v3147_v56, %v3142_v53  ;;  %v2318_v53 = vpack.c.bf16 %v3243_v21, %v3238_v20  ;;  %v2208_v56 = vpack.c.bf16 %v3256_v29, %v3251_v28 }
 0x103   :  { %v592_v46 = vpop.f32.mrb[14].mxu0 }
 0x104   :  { %v594_v47 = vpop.f32.mrb[15].mxu0 }
 0x105   :  { %v611_v25 = vcombine.low %v592_v46, %v594_v47  ;;  %v1808_v24 = vcombine.low %v594_v47, %v594_v47  ;;  %v612_v48 = vcombine.high %v592_v46, %v594_v47  ;;  %v2206_v46 = vpack.c.bf16 %v3219_v3, %v3214_v26  ;;  %v1846_v26 = vld [vmem:[%s4095_s3 + $0x280] sm:$0xff]  ;;  %v1848_v3 = vld [vmem:[%s4095_s3 + $0x290] sm:$0xff] }
 0x107   :  { %v3135_v50 = vadd.f32 %v611_v25, %v477_v33  ;;  %v3137_v51 = vadd.f32 %v1808_v24, %v478_v6  ;;  %v598_v52 = vpop.f32.mrb[16].mxu0  ;;  %v2198_v33 = vpack.c.bf16 %v3167_v0, %v3162_v61  ;;  %v3273_v6 = vld [vmem:[%s4095_s3 + $0x270] sm:$0xff]  ;;  %v3322_v25 = vld [vmem:[%s4095_s3 + $0x608] sm:$0xff]  ;;  %v3327_v24 = vld [vmem:[%s4095_s3 + $0x618] sm:$0xff] }
 0x108   :  { %v1809_v57 = vcombine.low %v612_v48, %v598_v52  ;;  %v600_v58 = vpop.f32.mrb[17].mxu0 }
 0x109   :  { %v613_v1 = vcombine.low %v598_v52, %v600_v58  ;;  %v614_v9 = vcombine.high %v598_v52, %v600_v58  ;;  %v1811_v2 = vcombine.high %v600_v58, %v600_v58  ;;  %v2316_v52 = vpack.c.bf16 %v3233_v19, %v3228_v18 }
 0x10a   :  { %v3189_v10 = vadd.f32 %v1809_v57, %v479_v41  ;;  %v3304_v41 = vld [vmem:[%s4095_s3 + $0x288] sm:$0xff] }
 0x10b   :  { %v1810_v39 = vcombine.high %v594_v47, %v613_v1  ;;  %v3221_v13 = vadd.f32 %v614_v9, %v481_v43  ;;  %v3223_v15 = vadd.f32 %v1811_v2, %v482_v44  ;;  %v717_v16 = vpop.f32.mrb[0].mxu0  ;;  %v2314_v44 = vpack.c.bf16 %v3199_v17, %v3194_v14  ;;  %v3317_v47 = vld [vmem:[%s4095_s3 + $0x298] sm:$0xff] }
 0x10c   :  { %v2432_v22 = vadd.f32 %v717_v16, %v3123_v62  ;;  %v719_v23 = vpop.f32.mrb[1].mxu0 }
 0x10d   :  { %v3263_v62 = vadd.f32 %v1810_v39, %v480_v45  ;;  %v2433_v31 = vadd.f32 %v719_v23, %v3127_v63  ;;  %v3283_v63 = vld [vmem:[%s4095_s3 + $0x5f8] sm:$0xff]  ;;  %v2204_v45 = vpack.c.bf16 %v3209_v12, %v3204_v11 }
 0x10e   :  { %v3285_v35 = vmax.f32 %v2432_v22, 0.0  ;;  %v2320_v61 = vpack.c.bf16 %v3283_v63, %v3278_v34  ;;  %v4107_v63 = vpack.c.bf16 %v3273_v6, %v3261_v30  ;;  %v1850_v30 = vld [vmem:[%s4095_s3 + $0x2a0] sm:$0xff]  ;;  %v1852_v6 = vld [vmem:[%s4095_s3 + $0x2b0] sm:$0xff] }
 0x10f   :  { %v3306_v42 = vmax.f32 %v2433_v31, 0.0  ;;  %v723_v43 = vpop.f32.mrb[18].mxu0 }
 0x110   :  { %v725_v48 = vpop.f32.mrb[19].mxu0  ;;  %v1165_v0 = vrot.slane %v3285_v35, 2  ;;  %v1004_v16 = vrot.slane %v3285_v35, 1  ;;  %v1326_v22 = vrot.slane %v3285_v35, 3  ;;  %v1487_v54 = vrot.slane %v3285_v35, 4 }
 0x111   :  { %v742_v58 = vcombine.low %v723_v43, %v725_v48  ;;  %v1820_v59 = vcombine.low %v725_v48, %v725_v48  ;;  %1824 = vmatprep.mubr.msk.f32.mxu0 %vm848_vm10, %v3306_v42  ;;  %v743_v60 = vcombine.high %v723_v43, %v725_v48  ;;  %v1168_v43 = vrot.slane %v3306_v42, 2 }
 0x112   :  { %920 = vmatmul.mubr.f32.vlgmr.msra.gmra.mrb[22].mxu0 %v3285_v35  ;;  %v1007_v55 = vrot.slane %v3306_v42, 1  ;;  %v1329_v9 = vrot.slane %v3306_v42, 3  ;;  %v4109_v35 = vpack.c.bf16 %v3317_v47, %v3304_v41  ;;  %v1968_v41 = vld [vmem:[%s4095_s3 + $0x630] sm:$0xff]  ;;  %v1855_v47 = vld [vmem:[%s4095_s3 + $0x2c8] sm:$0xff] }
 0x113   :  { %v762_v4 = vadd.f32 %v742_v58, %v3135_v50  ;;  %v763_v5 = vadd.f32 %v1820_v59, %v3137_v51  ;;  %2195 = vmatpush1.bf16.msra.mxu0 %v2194_v27  ;;  %v729_v39 = vpop.f32.mrb[20].mxu0 }
 0x114   :  { %v1821_v23 = vcombine.low %v743_v60, %v729_v39  ;;  %v731_v31 = vpop.f32.mrb[21].mxu0  ;;  %2197 = vmatprep.subr.bf16.mxu0 %v2196_v32  ;;  %v1490_v60 = vrot.slane %v3306_v42, 4  ;;  %v4108_v42 = vpack.c.bf16 %v3299_v40, %v3294_v38  ;;  %v4110_v38 = vpack.c.bf16 %v3327_v24, %v3322_v25  ;;  %v1973_v25 = vld [vmem:[%s4095_s3 + $0x658] sm:$0xff] }
 0x115   :  { %v3356_v2 = vmax.f32 %v762_v4, 0.0  ;;  %v3358_v50 = vmax.f32 %v763_v5, 0.0  ;;  %v744_v51 = vcombine.low %v729_v39, %v731_v31  ;;  %v745_v27 = vcombine.high %v729_v39, %v731_v31 }
 0x116   :  { %v764_v58 = vadd.f32 %v1821_v23, %v3189_v10  ;;  %v1823_v59 = vcombine.high %v731_v31, %v731_v31  ;;  %v2218_v24 = vpack.c.bf16 %v1852_v6, %v1850_v30  ;;  %v1984_v30 = vld [vmem:[%s4095_s3 + $0x6b0] sm:$0xff]  ;;  %v1871_v6 = vld [vmem:[%s4095_s3 + $0x348] sm:$0xff] }
 0x117   :  { %v1822_v32 = vcombine.high %v725_v48, %v744_v51  ;;  %v766_v1 = vadd.f32 %v745_v27, %v3221_v13  ;;  %2199 = vmatpush1.bf16.msra.mxu0 %v2198_v33  ;;  %v1169_v57 = vrot.slane %v3358_v50, 2  ;;  %v1166_v4 = vrot.slane %v3356_v2, 2 }
 0x118   :  { %v3366_v5 = vmax.f32 %v764_v58, 0.0  ;;  %v767_v39 = vadd.f32 %v1823_v59, %v3223_v15  ;;  %2201 = vmatprep.subr.bf16.mxu0 %v2200_v36  ;;  %v1008_v10 = vrot.slane %v3358_v50, 1  ;;  %v1330_v23 = vrot.slane %v3358_v50, 3  ;;  %v1851_v59 = vld [vmem:[%s4095_s3 + $0x2a8] sm:$0xff] }
 0x119   :  { %v765_v31 = vadd.f32 %v1822_v32, %v3263_v62  ;;  %v3372_v48 = vmax.f32 %v766_v1, 0.0  ;;  %v1170_v13 = vsel %vm1164_vm11, %v1168_v43, %v1169_v57  ;;  %v1167_v33 = vsel %vm1164_vm11, %v1165_v0, %v1166_v4  ;;  %v1964_v43 = vld [vmem:[%s4095_s3 + $0x610] sm:$0xff]  ;;  %v1969_v4 = vld [vmem:[%s4095_s3 + $0x638] sm:$0xff] }
 0x11a   :  { %v775_v51 = vmax.f32 %v767_v39, 0.0  ;;  %1948 = vmatprep.mubr.msk.f32.mxu1 %vm848_vm10, %v1170_v13  ;;  %v1009_v27 = vsel %vm1003_vm12, %v1007_v55, %v1008_v10  ;;  %v1171_v15 = vrot.slane %v3366_v5, 2  ;;  %v1331_v36 = vsel %vm1325_vm13, %v1329_v9, %v1330_v23  ;;  %v1966_v23 = vld [vmem:[%s4095_s3 + $0x620] sm:$0xff] }
 0x11b   :  { %v773_v58 = vmax.f32 %v765_v31, 0.0  ;;  %2203 = vmatpush1.bf16.msra.mxu0 %v2202_v37  ;;  %1248 = vmatmul.mubr.f32.vlgmr.msra.gmra.mrb[0].mxu1 %v1167_v33  ;;  %v1172_v62 = vrot.slane %v3372_v48, 2  ;;  %v1005_v57 = vrot.slane %v3356_v2, 1  ;;  %v1010_v0 = vrot.slane %v3366_v5, 1  ;;  %v1857_v31 = vld [vmem:[%s4095_s3 + $0x2d8] sm:$0xff] }
 0x11c   :  { %2315 = vmatpush1.bf16.msra.mxu1 %v2314_v44  ;;  %2205 = vmatprep.subr.bf16.mxu0 %v2204_v45  ;;  %v1175_v55 = vrot.slane %v775_v51, 2  ;;  %v1014_v1 = vrot.slane %v775_v51, 1  ;;  %v1011_v7 = vrot.slane %v3372_v48, 1  ;;  %v1327_v8 = vrot.slane %v3356_v2, 3 }
 0x11d   :  { %1825 = vmatprep.mubr.msk.f32.mxu0 %vm848_vm10, %v773_v58  ;;  %2317 = vmatprep.subr.bf16.mxu1 %v2316_v52  ;;  %v1174_v37 = vrot.slane %v773_v58, 2  ;;  %v1173_v14 = vsel %vm1164_vm11, %v1171_v15, %v1172_v62  ;;  %v3400_v17 = vsel %vm1003_vm12, %v1004_v16, %v1005_v57  ;;  %v1013_v11 = vrot.slane %v773_v58, 1  ;;  %v1970_v15 = vld [vmem:[%s4095_s3 + $0x640] sm:$0xff]  ;;  %v1859_v62 = vld [vmem:[%s4095_s3 + $0x2e8] sm:$0xff]  ;;  %v1861_v57 = vld [vmem:[%s4095_s3 + $0x2f8] sm:$0xff] }
 0x11e   :  { %926 = vmatmul.mubr.f32.gmra.mrb[24].mxu0 %v3366_v5  ;;  %v3404_v12 = vsel %vm1003_vm12, %v1010_v0, %v1011_v7  ;;  %v3407_v44 = vsel %vm1325_vm13, %v1326_v22, %v1327_v8  ;;  %v1335_v45 = vrot.slane %v773_v58, 3  ;;  %v1336_v9 = vrot.slane %v775_v51, 3  ;;  %v1975_v0 = vld [vmem:[%s4095_s3 + $0x668] sm:$0xff] }
 0x11f   :  { %2207 = vmatpush1.bf16.msra.mxu0 %v2206_v46  ;;  %1886 = vmatprep.mubr.msk.f32.mxu0 %vm848_vm10, %v1009_v27  ;;  %v1176_v18 = vsel %vm1164_vm11, %v1174_v37, %v1175_v55  ;;  %v3415_v19 = vsel %vm1003_vm12, %v1013_v11, %v1014_v1  ;;  %v1332_v52 = vrot.slane %v3366_v5, 3  ;;  %v1333_v16 = vrot.slane %v3372_v48, 3  ;;  %v1962_v46 = vld [vmem:[%s4095_s3 + $0x600] sm:$0xff]  ;;  %v1856_v27 = vld [vmem:[%s4095_s3 + $0x2d0] sm:$0xff]  ;;  %v1977_v55 = vld [vmem:[%s4095_s3 + $0x678] sm:$0xff] }
 0x120   :  { %2319 = vmatpush1.bf16.msra.mxu1 %v2318_v53  ;;  %1949 = vmatprep.mubr.msk.f32.mxu1 %vm848_vm10, %v1176_v18  ;;  %v3433_v22 = vsel %vm1325_vm13, %v1335_v45, %v1336_v9  ;;  %v1491_v20 = vrot.slane %v3358_v50, 4  ;;  %v1488_v21 = vrot.slane %v3356_v2, 4  ;;  %v1496_v53 = vrot.slane %v773_v58, 4  ;;  %v1853_v50 = vld [vmem:[%s4095_s3 + $0x2b8] sm:$0xff]  ;;  %v1972_v58 = vld [vmem:[%s4095_s3 + $0x650] sm:$0xff]  ;;  %v1858_v37 = vld [vmem:[%s4095_s3 + $0x2e0] sm:$0xff] }
 0x121   :  { %2209 = vmatprep.subr.bf16.mxu0 %v2208_v56  ;;  %1254 = vmatmul.mubr.f32.gmra.mrb[2].mxu1 %v1173_v14  ;;  %v3450_v2 = vsel %vm1325_vm13, %v1332_v52, %v1333_v16  ;;  %v1497_v32 = vrot.slane %v775_v51, 4  ;;  %v1493_v28 = vrot.slane %v3366_v5, 4  ;;  %v1494_v29 = vrot.slane %v3372_v48, 4  ;;  %v1967_v56 = vld [vmem:[%s4095_s3 + $0x628] sm:$0xff]  ;;  %v1854_v51 = vld [vmem:[%s4095_s3 + $0x2c0] sm:$0xff]  ;;  %v1860_v14 = vld [vmem:[%s4095_s3 + $0x2f0] sm:$0xff] }
 0x122   :  { %2321 = vmatprep.subr.bf16.mxu1 %v2320_v61  ;;  %2010 = vmatprep.mubr.msk.f32.mxu1 %vm848_vm10, %v1331_v36  ;;  %v3467_v5 = vsel %vm1486_vm14, %v1490_v60, %v1491_v20  ;;  %v3472_v34 = vsel %vm1486_vm14, %v1487_v54, %v1488_v21  ;;  %v2214_v61 = vpack.c.bf16 %v1848_v3, %v1846_v26  ;;  %v1971_v48 = vld [vmem:[%s4095_s3 + $0x648] sm:$0xff]  ;;  %v1974_v11 = vld [vmem:[%s4095_s3 + $0x660] sm:$0xff]  ;;  %v1976_v9 = vld [vmem:[%s4095_s3 + $0x670] sm:$0xff] }
 0x123   :  { %2211 = vmatpush1.bf16.msra.mxu0 %v4107_v63  ;;  %v3478_v39 = vsel %vm1486_vm14, %v1496_v53, %v1497_v32  ;;  %v3481_v10 = vsel %vm1486_vm14, %v1493_v28, %v1494_v29  ;;  %v2326_v54 = vpack.c.bf16 %v1964_v43, %v1962_v46  ;;  %v2216_v60 = vpack.c.bf16 %v1853_v50, %v1851_v59  ;;  %v1863_v18 = vld [vmem:[%s4095_s3 + $0x308] sm:$0xff]  ;;  %v1865_v52 = vld [vmem:[%s4095_s3 + $0x318] sm:$0xff]  ;;  %v1862_v21 = vld [vmem:[%s4095_s3 + $0x300] sm:$0xff] }
 0x124   :  { %2323 = vmatpush1.bf16.msra.mxu1 %v4108_v42  ;;  %2213 = vmatprep.subr.bf16.mxu0 %v4109_v35  ;;  %v2328_v40 = vpack.c.bf16 %v1969_v4, %v1967_v56  ;;  %v2330_v13 = vpack.c.bf16 %v1968_v41, %v1966_v23  ;;  %v2220_v33 = vpack.c.bf16 %v1857_v31, %v1855_v47  ;;  %v1979_v16 = vld [vmem:[%s4095_s3 + $0x688] sm:$0xff]  ;;  %v1981_v26 = vld [vmem:[%s4095_s3 + $0x698] sm:$0xff]  ;;  %v1864_v53 = vld [vmem:[%s4095_s3 + $0x310] sm:$0xff] }
 0x125   :  { %2325 = vmatprep.subr.bf16.mxu1 %v4110_v38  ;;  %v2332_v36 = vpack.c.bf16 %v1973_v25, %v1971_v48  ;;  %v2222_v1 = vpack.c.bf16 %v1856_v27, %v1854_v51  ;;  %v2334_v7 = vpack.c.bf16 %v1972_v58, %v1970_v15  ;;  %v2224_v8 = vpack.c.bf16 %v1861_v57, %v1859_v62  ;;  %v1978_v43 = vld [vmem:[%s4095_s3 + $0x680] sm:$0xff]  ;;  %v1980_v50 = vld [vmem:[%s4095_s3 + $0x690] sm:$0xff]  ;;  %v1867_v32 = vld [vmem:[%s4095_s3 + $0x328] sm:$0xff] }
 0x126   :  { %v2336_v45 = vpack.c.bf16 %v1977_v55, %v1975_v0  ;;  %v2226_v3 = vpack.c.bf16 %v1860_v14, %v1858_v37  ;;  %v2338_v46 = vpack.c.bf16 %v1976_v9, %v1974_v11  ;;  %v2228_v20 = vpack.c.bf16 %v1865_v52, %v1863_v18  ;;  %v1869_v28 = vld [vmem:[%s4095_s3 + $0x338] sm:$0xff]  ;;  %v1983_v29 = vld [vmem:[%s4095_s3 + $0x6a8] sm:$0xff]  ;;  %v1866_v42 = vld [vmem:[%s4095_s3 + $0x320] sm:$0xff] }
 0x127   :  { %2215 = vmatpush1.bf16.msra.mxu0 %v2214_v61  ;;  %v2340_v59 = vpack.c.bf16 %v1981_v26, %v1979_v16  ;;  %v1985_v56 = vld [vmem:[%s4095_s3 + $0x6b8] sm:$0xff]  ;;  %v2230_v4 = vpack.c.bf16 %v1864_v53, %v1862_v21  ;;  %v2342_v63 = vpack.c.bf16 %v1980_v50, %v1978_v43  ;;  %v2232_v61 = vpack.c.bf16 %v1869_v28, %v1867_v32  ;;  %v1868_v35 = vld [vmem:[%s4095_s3 + $0x330] sm:$0xff]  ;;  %v1987_v38 = vld [vmem:[%s4095_s3 + $0x6c8] sm:$0xff] }
 0x128   :  { %2327 = vmatpush1.bf16.msra.mxu1 %v2326_v54  ;;  %2217 = vmatprep.subr.bf16.mxu0 %v2216_v60  ;;  %v1982_v54 = vld [vmem:[%s4095_s3 + $0x6a0] sm:$0xff]  ;;  %v2344_v60 = vpack.c.bf16 %v1985_v56, %v1983_v29  ;;  %v1873_v23 = vld [vmem:[%s4095_s3 + $0x358] sm:$0xff]  ;;  %v2234_v41 = vpack.c.bf16 %v1868_v35, %v1866_v42  ;;  %v1872_v25 = vld [vmem:[%s4095_s3 + $0x350] sm:$0xff] }
 0x129   :  { %2329 = vmatprep.subr.bf16.mxu1 %v2328_v40  ;;  %v1989_v40 = vld [vmem:[%s4095_s3 + $0x6d8] sm:$0xff]  ;;  %v2346_v47 = vpack.c.bf16 %v1984_v30, %v1982_v54  ;;  %v2236_v31 = vpack.c.bf16 %v1873_v23, %v1871_v6  ;;  %v1870_v48 = vld [vmem:[%s4095_s3 + $0x340] sm:$0xff]  ;;  %v1875_v51 = vld [vmem:[%s4095_s3 + $0x368] sm:$0xff] }
 0x12a   :  { %v1877_v27 = vld [vmem:[%s4095_s3 + $0x378] sm:$0xff]  ;;  %v1991_v15 = vld [vmem:[%s4095_s3 + $0x6e8] sm:$0xff]  ;;  %v2238_v58 = vpack.c.bf16 %v1872_v25, %v1870_v48  ;;  %v1874_v0 = vld [vmem:[%s4095_s3 + $0x360] sm:$0xff] }
 0x12b   :  { %2219 = vmatpush1.bf16.msra.mxu0 %v2218_v24  ;;  %v1986_v24 = vld [vmem:[%s4095_s3 + $0x6c0] sm:$0xff]  ;;  %v2240_v57 = vpack.c.bf16 %v1877_v27, %v1875_v51  ;;  %v1876_v55 = vld [vmem:[%s4095_s3 + $0x370] sm:$0xff]  ;;  %v1879_v37 = vld [vmem:[%s4095_s3 + $0x388] sm:$0xff] }
 0x12c   :  { %2331 = vmatpush1.bf16.msra.mxu1 %v2330_v13  ;;  %2221 = vmatprep.subr.bf16.mxu0 %v2220_v33  ;;  %v2348_v13 = vpack.c.bf16 %v1989_v40, %v1987_v38  ;;  %v1988_v33 = vld [vmem:[%s4095_s3 + $0x6d0] sm:$0xff]  ;;  %v1881_v14 = vld [vmem:[%s4095_s3 + $0x398] sm:$0xff]  ;;  %v1995_v11 = vld [vmem:[%s4095_s3 + $0x708] sm:$0xff]  ;;  %v2242_v9 = vpack.c.bf16 %v1876_v55, %v1874_v0 }
 0x12d   :  { %2333 = vmatprep.subr.bf16.mxu1 %v2332_v36  ;;  %v1993_v36 = vld [vmem:[%s4095_s3 + $0x6f8] sm:$0xff]  ;;  %v2350_v62 = vpack.c.bf16 %v1988_v33, %v1986_v24  ;;  %v2244_v52 = vpack.c.bf16 %v1881_v14, %v1879_v37  ;;  %v1878_v16 = vld [vmem:[%s4095_s3 + $0x380] sm:$0xff]  ;;  %v1880_v26 = vld [vmem:[%s4095_s3 + $0x390] sm:$0xff] }
 0x12e   :  { %v1883_v21 = vld [vmem:[%s4095_s3 + $0x3a8] sm:$0xff]  ;;  %v1885_v53 = vld [vmem:[%s4095_s3 + $0x3b8] sm:$0xff]  ;;  %v2246_v50 = vpack.c.bf16 %v1880_v26, %v1878_v16  ;;  %v1882_v29 = vld [vmem:[%s4095_s3 + $0x3a0] sm:$0xff] }
 0x12f   :  { %2223 = vmatpush1.bf16.msra.mxu0 %v2222_v1  ;;  %v1990_v1 = vld [vmem:[%s4095_s3 + $0x6e0] sm:$0xff]  ;;  %v1999_v43 = vld [vmem:[%s4095_s3 + $0x728] sm:$0xff]  ;;  %v2248_v28 = vpack.c.bf16 %v1885_v53, %v1883_v21  ;;  %v1884_v56 = vld [vmem:[%s4095_s3 + $0x3b0] sm:$0xff] }
 0x130   :  { %2335 = vmatpush1.bf16.msra.mxu1 %v2334_v7  ;;  %2225 = vmatprep.subr.bf16.mxu0 %v2224_v8  ;;  %v2352_v7 = vpack.c.bf16 %v1993_v36, %v1991_v15  ;;  %v1992_v8 = vld [vmem:[%s4095_s3 + $0x6f0] sm:$0xff]  ;;  %v2003_v42 = vld [vmem:[%s4095_s3 + $0x748] sm:$0xff]  ;;  %v2005_v35 = vld [vmem:[%s4095_s3 + $0x758] sm:$0xff]  ;;  %v2250_v54 = vpack.c.bf16 %v1884_v56, %v1882_v29 }
 0x131   :  { %2337 = vmatprep.subr.bf16.mxu1 %v2336_v45  ;;  %v1997_v45 = vld [vmem:[%s4095_s3 + $0x718] sm:$0xff]  ;;  %v2354_v18 = vpack.c.bf16 %v1992_v8, %v1990_v1  ;;  %v2364_v30 = vpack.c.bf16 %v2005_v35, %v2003_v42  ;;  %v2002_v6 = vld [vmem:[%s4095_s3 + $0x740] sm:$0xff]  ;;  %v2004_v23 = vld [vmem:[%s4095_s3 + $0x750] sm:$0xff] }
 0x132   :  { %v2007_v38 = vld [vmem:[%s4095_s3 + $0x768] sm:$0xff]  ;;  %v2009_v40 = vld [vmem:[%s4095_s3 + $0x778] sm:$0xff]  ;;  %v2008_v48 = vld [vmem:[%s4095_s3 + $0x770] sm:$0xff] }
 0x133   :  { %2227 = vmatpush1.bf16.msra.mxu0 %v2226_v3  ;;  %v1994_v3 = vld [vmem:[%s4095_s3 + $0x700] sm:$0xff]  ;;  %v2013_v25 = vld [vmem:[%s4095_s3 + $0x788] sm:$0xff]  ;;  %v2015_v24 = vld [vmem:[%s4095_s3 + $0x798] sm:$0xff] }
 0x134   :  { %2339 = vmatpush1.bf16.msra.mxu1 %v2338_v46  ;;  %2229 = vmatprep.subr.bf16.mxu0 %v2228_v20  ;;  %v2356_v46 = vpack.c.bf16 %v1997_v45, %v1995_v11  ;;  %v1996_v20 = vld [vmem:[%s4095_s3 + $0x710] sm:$0xff]  ;;  %v2372_v33 = vpack.c.bf16 %v2015_v24, %v2013_v25  ;;  %v2012_v51 = vld [vmem:[%s4095_s3 + $0x780] sm:$0xff]  ;;  %v2017_v27 = vld [vmem:[%s4095_s3 + $0x7a8] sm:$0xff] }
 0x135   :  { %2341 = vmatprep.subr.bf16.mxu1 %v2340_v59  ;;  %v2001_v59 = vld [vmem:[%s4095_s3 + $0x738] sm:$0xff]  ;;  %v2358_v32 = vpack.c.bf16 %v1996_v20, %v1994_v3  ;;  %v2020_v1 = vld [vmem:[%s4095_s3 + $0x7c0] sm:$0xff]  ;;  %v2025_v8 = vld [vmem:[%s4095_s3 + $0x7e8] sm:$0xff] }
 0x136   :  { %v2024_v14 = vld [vmem:[%s4095_s3 + $0x7e0] sm:$0xff]  ;;  %v2026_v11 = vld [vmem:[%s4095_s3 + $0x7f0] sm:$0xff]  ;;  %v2029_v45 = vld [vmem:[%s4095_s3 + $0x808] sm:$0xff] }
 0x137   :  { %2231 = vmatpush1.bf16.msra.mxu0 %v2230_v4  ;;  %v2360_v4 = vpack.c.bf16 %v2001_v59, %v1999_v43  ;;  %v2033_v16 = vld [vmem:[%s4095_s3 + $0x828] sm:$0xff]  ;;  %v2035_v26 = vld [vmem:[%s4095_s3 + $0x838] sm:$0xff]  ;;  %v2032_v20 = vld [vmem:[%s4095_s3 + $0x820] sm:$0xff] }
 0x138   :  { %2343 = vmatpush1.bf16.msra.mxu1 %v2342_v63  ;;  %2233 = vmatprep.subr.bf16.mxu0 %v2232_v61  ;;  %v1998_v63 = vld [vmem:[%s4095_s3 + $0x720] sm:$0xff]  ;;  %v2000_v61 = vld [vmem:[%s4095_s3 + $0x730] sm:$0xff]  ;;  %v2037_v53 = vld [vmem:[%s4095_s3 + $0x848] sm:$0xff] }
 0x139   :  { %2345 = vmatprep.subr.bf16.mxu1 %v2344_v60  ;;  %v2362_v60 = vpack.c.bf16 %v2000_v61, %v1998_v63  ;;  %v2034_v21 = vld [vmem:[%s4095_s3 + $0x830] sm:$0xff]  ;;  %v2039_v43 = vld [vmem:[%s4095_s3 + $0x858] sm:$0xff]  ;;  %v2041_v29 = vld [vmem:[%s4095_s3 + $0x868] sm:$0xff] }
 0x13a   :  { %v2394_v59 = vpack.c.bf16 %v2034_v21, %v2032_v20  ;;  %v2043_v56 = vld [vmem:[%s4095_s3 + $0x878] sm:$0xff]  ;;  %v2040_v61 = vld [vmem:[%s4095_s3 + $0x860] sm:$0xff]  ;;  %v2042_v42 = vld [vmem:[%s4095_s3 + $0x870] sm:$0xff] }
 0x13b   :  { %2235 = vmatpush1.bf16.msra.mxu0 %v2234_v41  ;;  %v2366_v41 = vpack.c.bf16 %v2004_v23, %v2002_v6  ;;  %v2400_v63 = vpack.c.bf16 %v2043_v56, %v2041_v29  ;;  %v2045_v35 = vld [vmem:[%s4095_s3 + $0x888] sm:$0xff]  ;;  %v2044_v6 = vld [vmem:[%s4095_s3 + $0x880] sm:$0xff]  ;;  %v2046_v23 = vld [vmem:[%s4095_s3 + $0x890] sm:$0xff] }
 0x13c   :  { %2347 = vmatpush1.bf16.msra.mxu1 %v2346_v47  ;;  %2237 = vmatprep.subr.bf16.mxu0 %v2236_v31  ;;  %v2368_v47 = vpack.c.bf16 %v2009_v40, %v2007_v38  ;;  %v2006_v31 = vld [vmem:[%s4095_s3 + $0x760] sm:$0xff]  ;;  %v2049_v38 = vld [vmem:[%s4095_s3 + $0x8a8] sm:$0xff]  ;;  %v2051_v40 = vld [vmem:[%s4095_s3 + $0x8b8] sm:$0xff] }
 0x13d   :  { %2349 = vmatprep.subr.bf16.mxu1 %v2348_v13  ;;  %v2370_v13 = vpack.c.bf16 %v2008_v48, %v2006_v31  ;;  %v2048_v31 = vld [vmem:[%s4095_s3 + $0x8a0] sm:$0xff]  ;;  %v2050_v48 = vld [vmem:[%s4095_s3 + $0x8b0] sm:$0xff]  ;;  %v2053_v25 = vld [vmem:[%s4095_s3 + $0x8c8] sm:$0xff] }
 0x13e   :  { %v2055_v24 = vld [vmem:[%s4095_s3 + $0x8d8] sm:$0xff]  ;;  %v776_v21 = vld [vmem:[%s4097_s4] sm:$0x3] }
 0x13f   :  { %2239 = vmatpush1.bf16.msra.mxu0 %v2238_v58  ;;  %v2016_v58 = vld [vmem:[%s4095_s3 + $0x7a0] sm:$0xff] }
 0x140   :  { %2351 = vmatpush1.bf16.msra.mxu1 %v2350_v62  ;;  %2241 = vmatprep.subr.bf16.mxu0 %v2240_v57  ;;  %v2021_v62 = vld [vmem:[%s4095_s3 + $0x7c8] sm:$0xff]  ;;  %v2023_v57 = vld [vmem:[%s4095_s3 + $0x7d8] sm:$0xff] }
 0x141   :  { %2353 = vmatprep.subr.bf16.mxu1 %v2352_v7  ;;  %v2380_v55 = vpack.c.bf16 %v2023_v57, %v2021_v62  ;;  %v2022_v7 = vld [vmem:[%s4095_s3 + $0x7d0] sm:$0xff]  ;;  %v2061_v62 = vld [vmem:[%s4095_s3 + $0x908] sm:$0xff]  ;;  %v2063_v57 = vld [vmem:[%s4095_s3 + $0x918] sm:$0xff] }
 0x143   :  { %2243 = vmatpush1.bf16.msra.mxu0 %v2242_v9 }
 0x144   :  { %2355 = vmatpush1.bf16.msra.mxu1 %v2354_v18  ;;  %2245 = vmatprep.subr.bf16.mxu0 %v2244_v52  ;;  %v2028_v18 = vld [vmem:[%s4095_s3 + $0x800] sm:$0xff]  ;;  %v2030_v52 = vld [vmem:[%s4095_s3 + $0x810] sm:$0xff] }
 0x145   :  { %2357 = vmatprep.subr.bf16.mxu1 %v2356_v46  ;;  %v2390_v3 = vpack.c.bf16 %v2030_v52, %v2028_v18  ;;  %v2392_v46 = vpack.c.bf16 %v2035_v26, %v2033_v16  ;;  %v2068_v18 = vld [vmem:[%s4095_s3 + $0x940] sm:$0xff]  ;;  %v2070_v52 = vld [vmem:[%s4095_s3 + $0x950] sm:$0xff] }
 0x146   :  { %v2430_v16 = vpack.c.bf16 %v2070_v52, %v2068_v18 }
 0x147   :  { %2247 = vmatpush1.bf16.msra.mxu0 %v2246_v50  ;;  %v2396_v50 = vpack.c.bf16 %v2039_v43, %v2037_v53  ;;  %v4111_v53 = vsub.s32 0, %v3114_v49 }
 0x148   :  { %2359 = vmatpush1.bf16.msra.mxu1 %v2358_v32  ;;  %2249 = vmatprep.subr.bf16.mxu0 %v2248_v28  ;;  %v2036_v32 = vld [vmem:[%s4095_s3 + $0x840] sm:$0xff]  ;;  %v2038_v28 = vld [vmem:[%s4095_s3 + $0x850] sm:$0xff] }
 0x149   :  { %2361 = vmatprep.subr.bf16.mxu1 %v2360_v4  ;;  %v2398_v4 = vpack.c.bf16 %v2038_v28, %v2036_v32  ;;  %v781_v43 = vrot.slane %v776_v21, %v4111_v53 }
 0x14b   :  { %2251 = vmatpush1.bf16.msra.mxu0 %v2250_v54  ;;  %v2047_v54 = vld [vmem:[%s4095_s3 + $0x898] sm:$0xff] }
 0x14c   :  { %2363 = vmatpush1.bf16.msra.mxu1 %v2362_v60  ;;  %v2402_v60 = vpack.c.bf16 %v2042_v42, %v2040_v61 }
 0x14d   :  { %2365 = vmatprep.subr.bf16.mxu1 %v2364_v30  ;;  %v2404_v30 = vpack.c.bf16 %v2047_v54, %v2045_v35 }
 0x14e   :  { %1087 = vmatmul.mubr.f32.vlgmr.msra.gmra.mrb[22].mxu0 %v3400_v17  ;;  %v2014_v17 = vld [vmem:[%s4095_s3 + $0x790] sm:$0xff] }
 0x14f   :  { %1887 = vmatprep.mubr.msk.f32.mxu0 %vm848_vm10, %v3415_v19  ;;  %v2019_v19 = vld [vmem:[%s4095_s3 + $0x7b8] sm:$0xff]  ;;  %v2374_v15 = vpack.c.bf16 %v2014_v17, %v2012_v51  ;;  %v2052_v51 = vld [vmem:[%s4095_s3 + $0x8c0] sm:$0xff]  ;;  %v2054_v17 = vld [vmem:[%s4095_s3 + $0x8d0] sm:$0xff] }
 0x150   :  { %2367 = vmatpush1.bf16.msra.mxu1 %v2366_v41  ;;  %v2376_v36 = vpack.c.bf16 %v2019_v19, %v2017_v27  ;;  %v2406_v41 = vpack.c.bf16 %v2046_v23, %v2044_v6  ;;  %v2057_v27 = vld [vmem:[%s4095_s3 + $0x8e8] sm:$0xff]  ;;  %v2059_v19 = vld [vmem:[%s4095_s3 + $0x8f8] sm:$0xff] }
 0x151   :  { %2369 = vmatprep.subr.bf16.mxu1 %v2368_v47  ;;  %v2408_v47 = vpack.c.bf16 %v2051_v40, %v2049_v38 }
 0x152   :  { %1093 = vmatmul.mubr.f32.gmra.mrb[24].mxu0 %v3404_v12  ;;  %v2018_v12 = vld [vmem:[%s4095_s3 + $0x7b0] sm:$0xff] }
 0x153   :  { %v2378_v0 = vpack.c.bf16 %v2018_v12, %v2016_v58  ;;  %v2056_v58 = vld [vmem:[%s4095_s3 + $0x8e0] sm:$0xff]  ;;  %v2058_v12 = vld [vmem:[%s4095_s3 + $0x8f0] sm:$0xff] }
 0x154   :  { %2371 = vmatpush1.bf16.msra.mxu1 %v2370_v13  ;;  %v2410_v13 = vpack.c.bf16 %v2050_v48, %v2048_v31 }
 0x155   :  { %2373 = vmatprep.subr.bf16.mxu1 %v2372_v33  ;;  %v2412_v33 = vpack.c.bf16 %v2055_v24, %v2053_v25 }
 0x157   :  { %1409 = vmatmul.mubr.f32.vlgmr.msra.gmra.mrb[0].mxu1 %v3407_v44  ;;  %v2027_v44 = vld [vmem:[%s4095_s3 + $0x7f8] sm:$0xff] }
 0x158   :  { %2011 = vmatprep.mubr.msk.f32.mxu1 %vm848_vm10, %v3433_v22  ;;  %2375 = vmatpush1.bf16.msra.mxu1 %v2374_v15  ;;  %v2382_v22 = vpack.c.bf16 %v2022_v7, %v2020_v1  ;;  %v2384_v37 = vpack.c.bf16 %v2027_v44, %v2025_v8  ;;  %v2414_v15 = vpack.c.bf16 %v2054_v17, %v2052_v51  ;;  %v2060_v1 = vld [vmem:[%s4095_s3 + $0x900] sm:$0xff]  ;;  %v2062_v7 = vld [vmem:[%s4095_s3 + $0x910] sm:$0xff]  ;;  %v2065_v8 = vld [vmem:[%s4095_s3 + $0x928] sm:$0xff] }
 0x159   :  { %2377 = vmatprep.subr.bf16.mxu1 %v2376_v36  ;;  %v2416_v36 = vpack.c.bf16 %v2059_v19, %v2057_v27  ;;  %v2067_v44 = vld [vmem:[%s4095_s3 + $0x938] sm:$0xff] }
 0x15b   :  { %1415 = vmatmul.mubr.f32.gmra.mrb[2].mxu1 %v3450_v2  ;;  %v2031_v2 = vld [vmem:[%s4095_s3 + $0x818] sm:$0xff] }
 0x15c   :  { %2379 = vmatpush1.bf16.msra.mxu1 %v2378_v0  ;;  %2072 = vmatprep.mubr.msk.f32.mxu1 %vm848_vm10, %v3467_v5  ;;  %v2386_v5 = vpack.c.bf16 %v2026_v11, %v2024_v14  ;;  %v2388_v9 = vpack.c.bf16 %v2031_v2, %v2029_v45  ;;  %v2418_v0 = vpack.c.bf16 %v2058_v12, %v2056_v58  ;;  %v2064_v14 = vld [vmem:[%s4095_s3 + $0x920] sm:$0xff]  ;;  %v2066_v11 = vld [vmem:[%s4095_s3 + $0x930] sm:$0xff]  ;;  %v2069_v45 = vld [vmem:[%s4095_s3 + $0x948] sm:$0xff] }
 0x15d   :  { %2381 = vmatprep.subr.bf16.mxu1 %v2380_v55  ;;  %v2420_v55 = vpack.c.bf16 %v2063_v57, %v2061_v62  ;;  %v2071_v2 = vld [vmem:[%s4095_s3 + $0x958] sm:$0xff] }
 0x160   :  { %2383 = vmatpush1.bf16.msra.mxu1 %v2382_v22  ;;  %v2422_v22 = vpack.c.bf16 %v2062_v7, %v2060_v1 }
 0x161   :  { %2385 = vmatprep.subr.bf16.mxu1 %v2384_v37  ;;  %v2424_v37 = vpack.c.bf16 %v2067_v44, %v2065_v8 }
 0x164   :  { %2387 = vmatpush1.bf16.msra.mxu1 %v2386_v5  ;;  %v2426_v5 = vpack.c.bf16 %v2066_v11, %v2064_v14 }
 0x165   :  { %2389 = vmatprep.subr.bf16.mxu1 %v2388_v9  ;;  %v2428_v9 = vpack.c.bf16 %v2071_v2, %v2069_v45 }
 0x168   :  { %2391 = vmatpush1.bf16.msra.mxu1 %v2390_v3 }
 0x169   :  { %2393 = vmatprep.subr.bf16.mxu1 %v2392_v46 }
 0x16c   :  { %2395 = vmatpush1.bf16.msra.mxu1 %v2394_v59  ;;  %v4112_v59 = vsub.s32 1, %v3114_v49 }
 0x16d   :  { %2397 = vmatprep.subr.bf16.mxu1 %v2396_v50 }
 0x16e   :  { %v785_v50 = vrot.slane %v776_v21, %v4112_v59 }
 0x170   :  { %2399 = vmatpush1.bf16.msra.mxu1 %v2398_v4 }
 0x171   :  { %2401 = vmatprep.subr.bf16.mxu1 %v2400_v63 }
 0x174   :  { %2403 = vmatpush1.bf16.msra.mxu1 %v2402_v60 }
 0x175   :  { %2405 = vmatprep.subr.bf16.mxu1 %v2404_v30 }
 0x178   :  { %2407 = vmatpush1.bf16.msra.mxu1 %v2406_v41 }
 0x179   :  { %2409 = vmatprep.subr.bf16.mxu1 %v2408_v47 }
 0x17c   :  { %2411 = vmatpush1.bf16.msra.mxu1 %v2410_v13 }
 0x17d   :  { %2413 = vmatprep.subr.bf16.mxu1 %v2412_v33 }
 0x180   :  { %2415 = vmatpush1.bf16.msra.mxu1 %v2414_v15 }
 0x181   :  { %2417 = vmatprep.subr.bf16.mxu1 %v2416_v36 }
 0x184   :  { %2419 = vmatpush1.bf16.msra.mxu1 %v2418_v0 }
 0x185   :  { %2421 = vmatprep.subr.bf16.mxu1 %v2420_v55 }
 0x188   :  { %2423 = vmatpush1.bf16.msra.mxu1 %v2422_v22 }
 0x189   :  { %2425 = vmatprep.subr.bf16.mxu1 %v2424_v37 }
 0x18c   :  { %2427 = vmatpush1.bf16.msra.mxu1 %v2426_v5 }
 0x18d   :  { %2429 = vmatprep.subr.bf16.mxu1 %v2428_v9 }
 0x190   :  { %2431 = vmatpush1.bf16.msra.mxu1 %v2430_v16 }
 0x193   :  { %1570 = vmatmul.mubr.f32.vlgmr.msra.gmra.mrb[0].mxu1 %v3472_v34 }
 0x194   :  { %2073 = vmatprep.mubr.msk.f32.mxu1 %vm848_vm10, %v3478_v39 }
 0x197   :  { %1576 = vmatmul.mubr.f32.gmra.mrb[2].mxu1 %v3481_v10 }
 0x221   :  { %v1088_v26 = vpop.f32.mrb[22].mxu0 }
 0x222   :  { %v1090_v3 = vpop.f32.mrb[23].mxu0  ;;  %v2434_v34 = vadd.f32 %v1088_v26, %v781_v43 }
 0x223   :  { %v2436_v32 = vadd.f32 %v1090_v3, %v785_v50 }
 0x225   :  { %v1094_v46 = vpop.f32.mrb[24].mxu0 }
 0x226   :  { %v1096_v20 = vpop.f32.mrb[25].mxu0  ;;  %v2438_v56 = vadd.f32 %v1094_v46, %v781_v43 }
 0x227   :  { %v2440_v63 = vadd.f32 %v1096_v20, %v785_v50 }
 0x266   :  { %v1571_v28 = vpop.f32.mrb[0].mxu1 }
 0x267   :  { %v2435_v39 = vadd.f32 %v2434_v34, %v1571_v28  ;;  %v1573_v29 = vpop.f32.mrb[1].mxu1 }
 0x268   :  { %v2437_v10 = vadd.f32 %v2436_v32, %v1573_v29 }
 0x269   :  { %v1586_v4 = vmax.f32 %v2435_v39, 0.0 }
 0x26a   :  { %v1587_v61 = vmax.f32 %v2437_v10, 0.0  ;;  %v1577_v42 = vpop.f32.mrb[2].mxu1 }
 0x26b   :  { %1591 = vst.msk [vmem:[%s4098_s5] sm:$0xff] %vm1590_vm15, %v1586_v4  ;;  %v2439_v35 = vadd.f32 %v2438_v56, %v1577_v42  ;;  %v1579_v49 = vpop.f32.mrb[3].mxu1  ;;  %1604 = vrot.lane.b32.xlu1 %v1586_v4, %s2485_s12  ;;  %1595 = vrot.lane.b32.xlu0 %v1586_v4, %s2486_s13 }
 0x26c   :  { %2104 = vst.msk [vmem:[%s4098_s5 + $0x80] sm:$0xff] %vm1590_vm15, %v1587_v61  ;;  %v2441_v54 = vadd.f32 %v2440_v63, %v1579_v49 }
 0x26d   :  { %v1588_v60 = vmax.f32 %v2439_v35, 0.0 }
 0x26e   :  { %v1589_v30 = vmax.f32 %v2441_v54, 0.0 }
 0x26f   :  { %1592 = vst.msk [vmem:[%s4098_s5 + $0xa0] sm:$0xff] %vm1590_vm15, %v1588_v60  ;;  %1613 = vrot.lane.b32.xlu0 %v1586_v4, %s2487_s18  ;;  %1606 = vrot.lane.b32.xlu1 %v1588_v60, %s2485_s12 }
 0x270   :  { %2105 = vst.msk [vmem:[%s4098_s5 + $0x120] sm:$0xff] %vm1590_vm15, %v1589_v30 }
 0x273   :  { %1622 = vrot.lane.b32.xlu0 %v1586_v4, %s2488_s0  ;;  %1615 = vrot.lane.b32.xlu1 %v1588_v60, %s2487_s18 }
 0x277   :  { %1631 = vrot.lane.b32.xlu0 %v1586_v4, %s2489_s2  ;;  %1624 = vrot.lane.b32.xlu1 %v1588_v60, %s2488_s0 }
 0x27b   :  { %1640 = vrot.lane.b32.xlu0 %v1586_v4, %s2490_s21  ;;  %1633 = vrot.lane.b32.xlu1 %v1588_v60, %s2489_s2 }
 0x27f   :  { %1649 = vrot.lane.b32.xlu0 %v1586_v4, %s2491_s1  ;;  %1642 = vrot.lane.b32.xlu1 %v1588_v60, %s2490_s21 }
 0x283   :  { %1658 = vrot.lane.b32.xlu0 %v1586_v4, %s2492_s22  ;;  %1651 = vrot.lane.b32.xlu1 %v1588_v60, %s2491_s1 }
 0x287   :  { %1667 = vrot.lane.b32.xlu0 %v1586_v4, %s2493_s23  ;;  %1660 = vrot.lane.b32.xlu1 %v1588_v60, %s2492_s22 }
 0x28b   :  { %1676 = vrot.lane.b32.xlu0 %v1586_v4, %s2494_s24  ;;  %1669 = vrot.lane.b32.xlu1 %v1588_v60, %s2493_s23 }
 0x28f   :  { %1685 = vrot.lane.b32.xlu0 %v1586_v4, %s2495_s25  ;;  %1678 = vrot.lane.b32.xlu1 %v1588_v60, %s2494_s24 }
 0x293   :  { %1694 = vrot.lane.b32.xlu0 %v1586_v4, %s2496_s26  ;;  %1687 = vrot.lane.b32.xlu1 %v1588_v60, %s2495_s25 }
 0x297   :  { %1703 = vrot.lane.b32.xlu0 %v1586_v4, %s2497_s27  ;;  %1696 = vrot.lane.b32.xlu1 %v1588_v60, %s2496_s26 }
 0x29b   :  { %1712 = vrot.lane.b32.xlu0 %v1586_v4, %s2498_s28  ;;  %1705 = vrot.lane.b32.xlu1 %v1588_v60, %s2497_s27 }
 0x29f   :  { %1721 = vrot.lane.b32.xlu0 %v1586_v4, %s2499_s29  ;;  %1714 = vrot.lane.b32.xlu1 %v1588_v60, %s2498_s28 }
 0x2a3   :  { %1735 = vrot.lane.b32.xlu0 %v1587_v61, %s2486_s13  ;;  %1723 = vrot.lane.b32.xlu1 %v1588_v60, %s2499_s29 }
 0x2a7   :  { %1744 = vrot.lane.b32.xlu0 %v1587_v61, %s2485_s12  ;;  %1737 = vrot.lane.b32.xlu1 %v1589_v30, %s2486_s13 }
 0x2ab   :  { %1597 = vrot.lane.b32.xlu0 %v1588_v60, %s2486_s13  ;;  %1746 = vrot.lane.b32.xlu1 %v1589_v30, %s2485_s12 }
 0x2af   :  { %1753 = vrot.lane.b32.xlu0 %v1587_v61, %s2487_s18  ;;  %1755 = vrot.lane.b32.xlu1 %v1589_v30, %s2487_s18 }
 0x2dd   :  { %v1605_v6 = vpop.permute.xlu1 %1604  ;;  %v1596_v23 = vpop.permute.xlu0 %1595 }
 0x2de   :  { %2076 = vst.msk [vmem:[%s4098_s5 + $0x10] sm:$0xff] %vm1590_vm15, %v1605_v6  ;;  %2074 = vst.msk [vmem:[%s4098_s5 + $0x8] sm:$0xff] %vm1590_vm15, %v1596_v23 }
 0x2e1   :  { %v1614_v38 = vpop.permute.xlu0 %1613  ;;  %v1607_v40 = vpop.permute.xlu1 %1606 }
 0x2e2   :  { %2078 = vst.msk [vmem:[%s4098_s5 + $0x18] sm:$0xff] %vm1590_vm15, %v1614_v38  ;;  %2077 = vst.msk [vmem:[%s4098_s5 + $0xb0] sm:$0xff] %vm1590_vm15, %v1607_v40 }
 0x2e5   :  { %v1623_v41 = vpop.permute.xlu0 %1622  ;;  %v1616_v47 = vpop.permute.xlu1 %1615 }
 0x2e6   :  { %2080 = vst.msk [vmem:[%s4098_s5 + $0x20] sm:$0xff] %vm1590_vm15, %v1623_v41  ;;  %2079 = vst.msk [vmem:[%s4098_s5 + $0xb8] sm:$0xff] %vm1590_vm15, %v1616_v47 }
 0x2e9   :  { %v1632_v31 = vpop.permute.xlu0 %1631  ;;  %v1625_v48 = vpop.permute.xlu1 %1624 }
 0x2ea   :  { %2082 = vst.msk [vmem:[%s4098_s5 + $0x28] sm:$0xff] %vm1590_vm15, %v1632_v31  ;;  %2081 = vst.msk [vmem:[%s4098_s5 + $0xc0] sm:$0xff] %vm1590_vm15, %v1625_v48 }
 0x2ed   :  { %v1641_v25 = vpop.permute.xlu0 %1640  ;;  %v1634_v24 = vpop.permute.xlu1 %1633 }
 0x2ee   :  { %2084 = vst.msk [vmem:[%s4098_s5 + $0x30] sm:$0xff] %vm1590_vm15, %v1641_v25  ;;  %2083 = vst.msk [vmem:[%s4098_s5 + $0xc8] sm:$0xff] %vm1590_vm15, %v1634_v24 }
 0x2f1   :  { %v1650_v13 = vpop.permute.xlu0 %1649  ;;  %v1643_v33 = vpop.permute.xlu1 %1642 }
 0x2f2   :  { %2086 = vst.msk [vmem:[%s4098_s5 + $0x38] sm:$0xff] %vm1590_vm15, %v1650_v13  ;;  %2085 = vst.msk [vmem:[%s4098_s5 + $0xd0] sm:$0xff] %vm1590_vm15, %v1643_v33 }
 0x2f5   :  { %v1659_v51 = vpop.permute.xlu0 %1658  ;;  %v1652_v17 = vpop.permute.xlu1 %1651 }
 0x2f6   :  { %2088 = vst.msk [vmem:[%s4098_s5 + $0x40] sm:$0xff] %vm1590_vm15, %v1659_v51  ;;  %2087 = vst.msk [vmem:[%s4098_s5 + $0xd8] sm:$0xff] %vm1590_vm15, %v1652_v17 }
 0x2f9   :  { %v1668_v27 = vpop.permute.xlu0 %1667  ;;  %v1661_v19 = vpop.permute.xlu1 %1660 }
 0x2fa   :  { %2090 = vst.msk [vmem:[%s4098_s5 + $0x48] sm:$0xff] %vm1590_vm15, %v1668_v27  ;;  %2089 = vst.msk [vmem:[%s4098_s5 + $0xe0] sm:$0xff] %vm1590_vm15, %v1661_v19 }
 0x2fd   :  { %v1677_v15 = vpop.permute.xlu0 %1676  ;;  %v1670_v36 = vpop.permute.xlu1 %1669 }
 0x2fe   :  { %2092 = vst.msk [vmem:[%s4098_s5 + $0x50] sm:$0xff] %vm1590_vm15, %v1677_v15  ;;  %2091 = vst.msk [vmem:[%s4098_s5 + $0xe8] sm:$0xff] %vm1590_vm15, %v1670_v36 }
 0x301   :  { %v1686_v58 = vpop.permute.xlu0 %1685  ;;  %v1679_v12 = vpop.permute.xlu1 %1678 }
 0x302   :  { %2094 = vst.msk [vmem:[%s4098_s5 + $0x58] sm:$0xff] %vm1590_vm15, %v1686_v58  ;;  %2093 = vst.msk [vmem:[%s4098_s5 + $0xf0] sm:$0xff] %vm1590_vm15, %v1679_v12 }
 0x305   :  { %v1695_v62 = vpop.permute.xlu0 %1694  ;;  %v1688_v57 = vpop.permute.xlu1 %1687 }
 0x306   :  { %2096 = vst.msk [vmem:[%s4098_s5 + $0x60] sm:$0xff] %vm1590_vm15, %v1695_v62  ;;  %2095 = vst.msk [vmem:[%s4098_s5 + $0xf8] sm:$0xff] %vm1590_vm15, %v1688_v57 }
 0x309   :  { %v1704_v0 = vpop.permute.xlu0 %1703  ;;  %v1697_v55 = vpop.permute.xlu1 %1696 }
 0x30a   :  { %2098 = vst.msk [vmem:[%s4098_s5 + $0x68] sm:$0xff] %vm1590_vm15, %v1704_v0  ;;  %2097 = vst.msk [vmem:[%s4098_s5 + $0x100] sm:$0xff] %vm1590_vm15, %v1697_v55 }
 0x30d   :  { %v1713_v1 = vpop.permute.xlu0 %1712  ;;  %v1706_v7 = vpop.permute.xlu1 %1705 }
 0x30e   :  { %2100 = vst.msk [vmem:[%s4098_s5 + $0x70] sm:$0xff] %vm1590_vm15, %v1713_v1  ;;  %2099 = vst.msk [vmem:[%s4098_s5 + $0x108] sm:$0xff] %vm1590_vm15, %v1706_v7 }
 0x311   :  { %v1722_v8 = vpop.permute.xlu0 %1721  ;;  %v1715_v44 = vpop.permute.xlu1 %1714 }
 0x312   :  { %2102 = vst.msk [vmem:[%s4098_s5 + $0x78] sm:$0xff] %vm1590_vm15, %v1722_v8  ;;  %2101 = vst.msk [vmem:[%s4098_s5 + $0x110] sm:$0xff] %vm1590_vm15, %v1715_v44 }
 0x315   :  { %v1736_v22 = vpop.permute.xlu0 %1735  ;;  %v1724_v37 = vpop.permute.xlu1 %1723 }
 0x316   :  { %2106 = vst.msk [vmem:[%s4098_s5 + $0x88] sm:$0xff] %vm1590_vm15, %v1736_v22  ;;  %2103 = vst.msk [vmem:[%s4098_s5 + $0x118] sm:$0xff] %vm1590_vm15, %v1724_v37 }
 0x319   :  { %v1745_v14 = vpop.permute.xlu0 %1744  ;;  %v1738_v11 = vpop.permute.xlu1 %1737 }
 0x31a   :  { %2108 = vst.msk [vmem:[%s4098_s5 + $0x90] sm:$0xff] %vm1590_vm15, %v1745_v14  ;;  %2107 = vst.msk [vmem:[%s4098_s5 + $0x128] sm:$0xff] %vm1590_vm15, %v1738_v11 }
 0x31d   :  { %v1598_v45 = vpop.permute.xlu0 %1597  ;;  %v1747_v2 = vpop.permute.xlu1 %1746 }
 0x31e   :  { %2075 = vst.msk [vmem:[%s4098_s5 + $0xa8] sm:$0xff] %vm1590_vm15, %v1598_v45  ;;  %2109 = vst.msk [vmem:[%s4098_s5 + $0x130] sm:$0xff] %vm1590_vm15, %v1747_v2 }
 0x321   :  { %v1754_v5 = vpop.permute.xlu0 %1753  ;;  %v1756_v9 = vpop.permute.xlu1 %1755 }
 0x322   :  { %2110 = vst.msk [vmem:[%s4098_s5 + $0x98] sm:$0xff] %vm1590_vm15, %v1754_v5  ;;  %2111 = vst.msk [vmem:[%s4098_s5 + $0x138] sm:$0xff] %vm1590_vm15, %v1756_v9 }

</bundles_post_ra>
